<compile_context>
chip_gen: v5e
topology: v5e:2x2
jax: 0.10.0
libtpu: 0.0.40
codegen_flags: <defaults>
</compile_context>

<pallas_src>
import functools
import math

import jax
import jax.numpy as jnp
from jax import lax
from jax.experimental import pallas as pl
from jax.experimental.pallas import tpu as pltpu


def _gaussian_taps_1d(kernel_size, sigma):
    """1-D taps; outer(t, t) equals GaussianModel.get_gaussian_kernel (normalized)."""
    g = [math.exp(-(i - kernel_size // 2) ** 2 / (2.0 * sigma ** 2))
         for i in range(kernel_size)]
    s = sum(g)
    return tuple(v / s for v in g)


def _gloss_kernel(hr_ref, gt_ref, p1_ref, p2_ref, lf_ref, hf_ref, dpad_ref, *,
                  B, H, W, K, taps1d, criterion):
    """Fused GLoss forward.

    hr_ref, gt_ref : (B, H, W) unpadded images (B = N*C folded)
    p1/p2/lf/hf    : (1, 1) f32 loss outputs
    dpad_ref       : (B, Hp, Wp) f32 VMEM scratch for in-kernel zero padding
    """
    pad = (K - 1) // 2

    # Difference image once: blur(hr)-blur(gt) == blur(d), e_hr-e_gt == d-blur(d)
    d = hr_ref[...].astype(jnp.float32) - gt_ref[...].astype(jnp.float32)

    # In-kernel zero padding (matches nn.Conv2d default padding_mode='zeros').
    dpad_ref[...] = jnp.zeros_like(dpad_ref)
    dpad_ref[:, pad:pad + H, pad:pad + W] = d
    dpad = dpad_ref[...]                                  # (B, Hp, Wp)

    # Separable depthwise Gaussian blur of d: horizontal then vertical pass,
    # constant-scaled shifted adds on the VPU (taps baked as Python floats;
    # the PyTorch kernel is fixed, requires_grad=False).
    h = taps1d[0] * dpad[:, :, 0:W]
    for dx in range(1, K):
        h = h + taps1d[dx] * dpad[:, :, dx:dx + W]        # (B, Hp, W)

    g = taps1d[0] * h[:, 0:H, :]
    for dy in range(1, K):
        g = g + taps1d[dy] * h[:, dy:dy + H, :]           # (B, H, W) == blur(d)

    e = d - g                                             # high-frequency diff

    inv_n = 1.0 / float(B * H * W)                        # 'mean' reduction

    def crit_mean(v):                                     # -> (1, 1)
        v = jnp.abs(v) if criterion == "l1" else v * v
        s = jnp.sum(v, axis=0)                            # (H, W)   VALU adds
        s = jnp.sum(s, axis=0, keepdims=True)             # (1, W)   XLU
        s = jnp.sum(s, axis=1, keepdims=True)             # (1, 1)   XLU
        return s * inv_n

    p1 = crit_mean(d)
    lf = crit_mean(g)
    hf = crit_mean(e)

    p1_ref[...] = p1
    lf_ref[...] = lf
    hf_ref[...] = hf
    p2_ref[...] = lf + hf


def gloss_forward(hr, gt, *, kernel_size, sigma, criterion="l1"):
    """GLoss forward. hr, gt: (N, C, H, W). Returns (part1, part2, lf, hf)."""
    assert criterion in ("l1", "mse")
    assert kernel_size % 2 == 1, "even kernel_size diverges from F.conv2d geometry"
    assert hr.shape == gt.shape
    N, C, H, W = hr.shape
    K = kernel_size
    pad = (K - 1) // 2
    Hp, Wp = H + 2 * pad, W + 2 * pad
    B = N * C

    taps1d = _gaussian_taps_1d(K, sigma)

    # Free reshapes only — no concat / pad / dtype HBM round-trips.
    hr3 = hr.reshape(B, H, W)
    gt3 = gt.reshape(B, H, W)

    kernel = functools.partial(_gloss_kernel, B=B, H=H, W=W, K=K,
                               taps1d=taps1d, criterion=criterion)
    out_sd = jax.ShapeDtypeStruct((1, 1), jnp.float32)

    p1, p2, lf, hf = pl.pallas_call(
        kernel,
        out_shape=(out_sd, out_sd, out_sd, out_sd),
        grid_spec=pltpu.PrefetchScalarGridSpec(
            num_scalar_prefetch=0,
            grid=(1,),
            in_specs=[pl.BlockSpec((B, H, W), lambda i: (0, 0, 0)),
                      pl.BlockSpec((B, H, W), lambda i: (0, 0, 0))],
            out_specs=[pl.BlockSpec((1, 1), lambda i: (0, 0)) for _ in range(4)],
            scratch_shapes=[pltpu.VMEM((B, Hp, Wp), jnp.float32)],
        ),
        compiler_params=pltpu.CompilerParams(
            dimension_semantics=("arbitrary",)),
    )(hr3, gt3)

    return p1[0, 0], p2[0, 0], lf[0, 0], hf[0, 0]


def _reference_gloss(hr, gt, *, kernel_size, sigma, criterion="l1"):
    """Pure-JAX reference (depthwise conv on hr and gt separately, like PyTorch)."""
    K = kernel_size
    pad = (K - 1) // 2
    C = hr.shape[1]
    k1 = jnp.asarray(_gaussian_taps_1d(K, sigma), dtype=jnp.float32)
    k2 = jnp.outer(k1, k1)                                        # (K, K), sums to 1
    w = jnp.broadcast_to(k2[None, None], (C, 1, K, K))            # depthwise OIHW

    def blur(x):
        return lax.conv_general_dilated(
            x, w, window_strides=(1, 1), padding=[(pad, pad), (pad, pad)],
            dimension_numbers=("NCHW", "OIHW", "NCHW"),
            feature_group_count=C)

    def crit(a, b):
        dd = a - b
        return jnp.mean(jnp.abs(dd)) if criterion == "l1" else jnp.mean(dd * dd)

    g_hr, g_gt = blur(hr), blur(gt)
    e_hr, e_gt = hr - g_hr, gt - g_gt
    p1 = crit(hr, gt)
    lf = crit(g_hr, g_gt)
    hf = crit(e_hr, e_gt)
    return p1, lf + hf, lf, hf


if __name__ == "__main__":
    # Module config: GLoss(img_channels=4, kernel_size=5, sigma=1.5),
    # criterion = L1Loss (reduction='mean').
    img_channels, kernel_size, sigma = 4, 5, 1.5
    N, H, W = 2, 16, 16

    key = jax.random.PRNGKey(0)
    k1, k2 = jax.random.split(key)
    hr = jax.random.normal(k1, (N, img_channels, H, W), dtype=jnp.float32)
    gt = hr + 0.1 * jax.random.normal(k2, (N, img_channels, H, W),
                                      dtype=jnp.float32)

    out = gloss_forward(hr, gt, kernel_size=kernel_size, sigma=sigma,
                        criterion="l1")
    out = jax.block_until_ready(out)

    ref = _reference_gloss(hr, gt, kernel_size=kernel_size, sigma=sigma,
                           criterion="l1")
    names = ("part1", "part2", "part2_lf", "part2_hf")
    for name, o, r in zip(names, out, ref):
        assert jnp.allclose(o, r, atol=1e-5, rtol=1e-4), (name, o, r)

    print("KERNEL_OK")
</pallas_src>

<mosaic_0001>
module attributes {stable_mosaic.version = 11 : i64} {
  func.func @_gloss_kernel(%arg0: i32, %arg1: memref<8x16x16xf32, #tpu.memory_space<vmem>>, %arg2: memref<8x16x16xf32, #tpu.memory_space<vmem>>, %arg3: memref<1x1xf32, #tpu.memory_space<vmem>>, %arg4: memref<1x1xf32, #tpu.memory_space<vmem>>, %arg5: memref<1x1xf32, #tpu.memory_space<vmem>>, %arg6: memref<1x1xf32, #tpu.memory_space<vmem>>, %arg7: memref<8x20x20xf32, #tpu.memory_space<vmem>>) attributes {dimension_semantics = [#tpu.dimension_semantics<arbitrary>], iteration_bounds = array<i64: 1>, scalar_prefetch = 0 : i64, scratch_operands = 1 : i64, tpu.core_type = #tpu.core_type<tc>, window_params = [{pipeline_mode = #tpu.pipeline_mode<synchronous>, transform_indices = @transform_0, window_bounds = array<i64: 8, 16, 16>}, {pipeline_mode = #tpu.pipeline_mode<synchronous>, transform_indices = @transform_1, window_bounds = array<i64: 8, 16, 16>}, {pipeline_mode = #tpu.pipeline_mode<synchronous>, transform_indices = @transform_2, window_bounds = array<i64: 1, 1>}, {pipeline_mode = #tpu.pipeline_mode<synchronous>, transform_indices = @transform_3, window_bounds = array<i64: 1, 1>}, {pipeline_mode = #tpu.pipeline_mode<synchronous>, transform_indices = @transform_4, window_bounds = array<i64: 1, 1>}, {pipeline_mode = #tpu.pipeline_mode<synchronous>, transform_indices = @transform_5, window_bounds = array<i64: 1, 1>}]} {
    %c0 = arith.constant 0 : index
    %c0_0 = arith.constant 0 : index
    %c0_1 = arith.constant 0 : index
    %0 = vector.load %arg1[%c0, %c0_0, %c0_1] : memref<8x16x16xf32, #tpu.memory_space<vmem>>, vector<8x16x16xf32>
    %c0_2 = arith.constant 0 : index
    %c0_3 = arith.constant 0 : index
    %c0_4 = arith.constant 0 : index
    %1 = vector.load %arg2[%c0_2, %c0_3, %c0_4] : memref<8x16x16xf32, #tpu.memory_space<vmem>>, vector<8x16x16xf32>
    %2 = arith.subf %0, %1 : vector<8x16x16xf32>
    %cst = arith.constant 0.000000e+00 : f32
    %3 = vector.broadcast %cst : f32 to vector<8x20x20xf32>
    %c0_5 = arith.constant 0 : index
    %c0_6 = arith.constant 0 : index
    %c0_7 = arith.constant 0 : index
    %4 = vector.load %arg7[%c0_5, %c0_6, %c0_7] : memref<8x20x20xf32, #tpu.memory_space<vmem>>, vector<8x20x20xf32>
    tpu.vector_store %arg7[%c0_5, %c0_6, %c0_7], %3 {strides = array<i32>} : memref<8x20x20xf32, #tpu.memory_space<vmem>>, vector<8x20x20xf32>,
    %c0_8 = arith.constant 0 : index
    %c2 = arith.constant 2 : index
    %c2_9 = arith.constant 2 : index
    %5 = vector.load %arg7[%c0_8, %c2, %c2_9] : memref<8x20x20xf32, #tpu.memory_space<vmem>>, vector<8x16x16xf32>
    tpu.vector_store %arg7[%c0_8, %c2, %c2_9], %2 {strides = array<i32>} : memref<8x20x20xf32, #tpu.memory_space<vmem>>, vector<8x16x16xf32>,
    %c0_10 = arith.constant 0 : index
    %c0_11 = arith.constant 0 : index
    %c0_12 = arith.constant 0 : index
    %6 = vector.load %arg7[%c0_10, %c0_11, %c0_12] : memref<8x20x20xf32, #tpu.memory_space<vmem>>, vector<8x20x20xf32>
    %7 = vector.extract_strided_slice %6 {offsets = [0, 0, 0], sizes = [8, 20, 16], strides = [1, 1, 1]} : vector<8x20x20xf32> to vector<8x20x16xf32>
    %cst_13 = arith.constant 0.120078385 : f32
    %8 = vector.broadcast %cst_13 : f32 to vector<8x20x16xf32>
    %9 = arith.mulf %8, %7 : vector<8x20x16xf32>
    %10 = vector.extract_strided_slice %6 {offsets = [0, 0, 1], sizes = [8, 20, 16], strides = [1, 1, 1]} : vector<8x20x20xf32> to vector<8x20x16xf32>
    %cst_14 = arith.constant 0.233880758 : f32
    %11 = vector.broadcast %cst_14 : f32 to vector<8x20x16xf32>
    %12 = arith.mulf %11, %10 : vector<8x20x16xf32>
    %13 = arith.addf %9, %12 : vector<8x20x16xf32>
    %14 = vector.extract_strided_slice %6 {offsets = [0, 0, 2], sizes = [8, 20, 16], strides = [1, 1, 1]} : vector<8x20x20xf32> to vector<8x20x16xf32>
    %cst_15 = arith.constant 0.292081714 : f32
    %15 = vector.broadcast %cst_15 : f32 to vector<8x20x16xf32>
    %16 = arith.mulf %15, %14 : vector<8x20x16xf32>
    %17 = arith.addf %13, %16 : vector<8x20x16xf32>
    %18 = vector.extract_strided_slice %6 {offsets = [0, 0, 3], sizes = [8, 20, 16], strides = [1, 1, 1]} : vector<8x20x20xf32> to vector<8x20x16xf32>
    %cst_16 = arith.constant 0.233880758 : f32
    %19 = vector.broadcast %cst_16 : f32 to vector<8x20x16xf32>
    %20 = arith.mulf %19, %18 : vector<8x20x16xf32>
    %21 = arith.addf %17, %20 : vector<8x20x16xf32>
    %22 = vector.extract_strided_slice %6 {offsets = [0, 0, 4], sizes = [8, 20, 16], strides = [1, 1, 1]} : vector<8x20x20xf32> to vector<8x20x16xf32>
    %cst_17 = arith.constant 0.120078385 : f32
    %23 = vector.broadcast %cst_17 : f32 to vector<8x20x16xf32>
    %24 = arith.mulf %23, %22 : vector<8x20x16xf32>
    %25 = arith.addf %21, %24 : vector<8x20x16xf32>
    %26 = vector.extract_strided_slice %25 {offsets = [0, 0, 0], sizes = [8, 16, 16], strides = [1, 1, 1]} : vector<8x20x16xf32> to vector<8x16x16xf32>
    %cst_18 = arith.constant 0.120078385 : f32
    %27 = vector.broadcast %cst_18 : f32 to vector<8x16x16xf32>
    %28 = arith.mulf %27, %26 : vector<8x16x16xf32>
    %29 = vector.extract_strided_slice %25 {offsets = [0, 1, 0], sizes = [8, 16, 16], strides = [1, 1, 1]} : vector<8x20x16xf32> to vector<8x16x16xf32>
    %cst_19 = arith.constant 0.233880758 : f32
    %30 = vector.broadcast %cst_19 : f32 to vector<8x16x16xf32>
    %31 = arith.mulf %30, %29 : vector<8x16x16xf32>
    %32 = arith.addf %28, %31 : vector<8x16x16xf32>
    %33 = vector.extract_strided_slice %25 {offsets = [0, 2, 0], sizes = [8, 16, 16], strides = [1, 1, 1]} : vector<8x20x16xf32> to vector<8x16x16xf32>
    %cst_20 = arith.constant 0.292081714 : f32
    %34 = vector.broadcast %cst_20 : f32 to vector<8x16x16xf32>
    %35 = arith.mulf %34, %33 : vector<8x16x16xf32>
    %36 = arith.addf %32, %35 : vector<8x16x16xf32>
    %37 = vector.extract_strided_slice %25 {offsets = [0, 3, 0], sizes = [8, 16, 16], strides = [1, 1, 1]} : vector<8x20x16xf32> to vector<8x16x16xf32>
    %cst_21 = arith.constant 0.233880758 : f32
    %38 = vector.broadcast %cst_21 : f32 to vector<8x16x16xf32>
    %39 = arith.mulf %38, %37 : vector<8x16x16xf32>
    %40 = arith.addf %36, %39 : vector<8x16x16xf32>
    %41 = vector.extract_strided_slice %25 {offsets = [0, 4, 0], sizes = [8, 16, 16], strides = [1, 1, 1]} : vector<8x20x16xf32> to vector<8x16x16xf32>
    %cst_22 = arith.constant 0.120078385 : f32
    %42 = vector.broadcast %cst_22 : f32 to vector<8x16x16xf32>
    %43 = arith.mulf %42, %41 : vector<8x16x16xf32>
    %44 = arith.addf %40, %43 : vector<8x16x16xf32>
    %45 = arith.subf %2, %44 : vector<8x16x16xf32>
    %46 = math.absf %2 : vector<8x16x16xf32>
    %cst_23 = arith.constant dense<0.000000e+00> : vector<16x16xf32>
    %47 = vector.multi_reduction <add>, %46, %cst_23 [0] : vector<8x16x16xf32> to vector<16x16xf32>
    %cst_24 = arith.constant dense<0.000000e+00> : vector<16xf32>
    %48 = vector.multi_reduction <add>, %47, %cst_24 [0] : vector<16x16xf32> to vector<16xf32>
    %49 = vector.shape_cast %48 : vector<16xf32> to vector<1x16xf32>
    %cst_25 = arith.constant dense<0.000000e+00> : vector<1xf32>
    %50 = vector.multi_reduction <add>, %49, %cst_25 [1] : vector<1x16xf32> to vector<1xf32>
    %51 = vector.shape_cast %50 : vector<1xf32> to vector<1x1xf32>
    %cst_26 = arith.constant 4.8828125E-4 : f32
    %52 = vector.broadcast %cst_26 : f32 to vector<1x1xf32>
    %53 = arith.mulf %51, %52 : vector<1x1xf32>
    %54 = math.absf %44 : vector<8x16x16xf32>
    %cst_27 = arith.constant dense<0.000000e+00> : vector<16x16xf32>
    %55 = vector.multi_reduction <add>, %54, %cst_27 [0] : vector<8x16x16xf32> to vector<16x16xf32>
    %cst_28 = arith.constant dense<0.000000e+00> : vector<16xf32>
    %56 = vector.multi_reduction <add>, %55, %cst_28 [0] : vector<16x16xf32> to vector<16xf32>
    %57 = vector.shape_cast %56 : vector<16xf32> to vector<1x16xf32>
    %cst_29 = arith.constant dense<0.000000e+00> : vector<1xf32>
    %58 = vector.multi_reduction <add>, %57, %cst_29 [1] : vector<1x16xf32> to vector<1xf32>
    %59 = vector.shape_cast %58 : vector<1xf32> to vector<1x1xf32>
    %cst_30 = arith.constant 4.8828125E-4 : f32
    %60 = vector.broadcast %cst_30 : f32 to vector<1x1xf32>
    %61 = arith.mulf %59, %60 : vector<1x1xf32>
    %62 = math.absf %45 : vector<8x16x16xf32>
    %cst_31 = arith.constant dense<0.000000e+00> : vector<16x16xf32>
    %63 = vector.multi_reduction <add>, %62, %cst_31 [0] : vector<8x16x16xf32> to vector<16x16xf32>
    %cst_32 = arith.constant dense<0.000000e+00> : vector<16xf32>
    %64 = vector.multi_reduction <add>, %63, %cst_32 [0] : vector<16x16xf32> to vector<16xf32>
    %65 = vector.shape_cast %64 : vector<16xf32> to vector<1x16xf32>
    %cst_33 = arith.constant dense<0.000000e+00> : vector<1xf32>
    %66 = vector.multi_reduction <add>, %65, %cst_33 [1] : vector<1x16xf32> to vector<1xf32>
    %67 = vector.shape_cast %66 : vector<1xf32> to vector<1x1xf32>
    %cst_34 = arith.constant 4.8828125E-4 : f32
    %68 = vector.broadcast %cst_34 : f32 to vector<1x1xf32>
    %69 = arith.mulf %67, %68 : vector<1x1xf32>
    %c0_35 = arith.constant 0 : index
    %c0_36 = arith.constant 0 : index
    %70 = vector.load %arg3[%c0_35, %c0_36] : memref<1x1xf32, #tpu.memory_space<vmem>>, vector<1x1xf32>
    tpu.vector_store %arg3[%c0_35, %c0_36], %53 {strides = array<i32>} : memref<1x1xf32, #tpu.memory_space<vmem>>, vector<1x1xf32>,
    %c0_37 = arith.constant 0 : index
    %c0_38 = arith.constant 0 : index
    %71 = vector.load %arg5[%c0_37, %c0_38] : memref<1x1xf32, #tpu.memory_space<vmem>>, vector<1x1xf32>
    tpu.vector_store %arg5[%c0_37, %c0_38], %61 {strides = array<i32>} : memref<1x1xf32, #tpu.memory_space<vmem>>, vector<1x1xf32>,
    %c0_39 = arith.constant 0 : index
    %c0_40 = arith.constant 0 : index
    %72 = vector.load %arg6[%c0_39, %c0_40] : memref<1x1xf32, #tpu.memory_space<vmem>>, vector<1x1xf32>
    tpu.vector_store %arg6[%c0_39, %c0_40], %69 {strides = array<i32>} : memref<1x1xf32, #tpu.memory_space<vmem>>, vector<1x1xf32>,
    %73 = arith.addf %61, %69 : vector<1x1xf32>
    %c0_41 = arith.constant 0 : index
    %c0_42 = arith.constant 0 : index
    %74 = vector.load %arg4[%c0_41, %c0_42] : memref<1x1xf32, #tpu.memory_space<vmem>>, vector<1x1xf32>
    tpu.vector_store %arg4[%c0_41, %c0_42], %73 {strides = array<i32>} : memref<1x1xf32, #tpu.memory_space<vmem>>, vector<1x1xf32>,
    return
  }
  func.func @transform_0(%arg0: i32) -> (i32, i32, i32) {
    %c0_i32 = arith.constant 0 : i32
    %c0_i32_0 = arith.constant 0 : i32
    %c0_i32_1 = arith.constant 0 : i32
    %c0_i32_2 = arith.constant 0 : i32
    return %c0_i32, %c0_i32_0, %c0_i32_1 : i32, i32, i32
  }
  func.func @transform_1(%arg0: i32) -> (i32, i32, i32) {
    %c0_i32 = arith.constant 0 : i32
    %c0_i32_0 = arith.constant 0 : i32
    %c0_i32_1 = arith.constant 0 : i32
    %c0_i32_2 = arith.constant 0 : i32
    return %c0_i32, %c0_i32_0, %c0_i32_1 : i32, i32, i32
  }
  func.func @transform_2(%arg0: i32) -> (i32, i32) {
    %c0_i32 = arith.constant 0 : i32
    %c0_i32_0 = arith.constant 0 : i32
    %c0_i32_1 = arith.constant 0 : i32
    return %c0_i32, %c0_i32_0 : i32, i32
  }
  func.func @transform_3(%arg0: i32) -> (i32, i32) {
    %c0_i32 = arith.constant 0 : i32
    %c0_i32_0 = arith.constant 0 : i32
    %c0_i32_1 = arith.constant 0 : i32
    return %c0_i32, %c0_i32_0 : i32, i32
  }
  func.func @transform_4(%arg0: i32) -> (i32, i32) {
    %c0_i32 = arith.constant 0 : i32
    %c0_i32_0 = arith.constant 0 : i32
    %c0_i32_1 = arith.constant 0 : i32
    return %c0_i32, %c0_i32_0 : i32, i32
  }
  func.func @transform_5(%arg0: i32) -> (i32, i32) {
    %c0_i32 = arith.constant 0 : i32
    %c0_i32_0 = arith.constant 0 : i32
    %c0_i32_1 = arith.constant 0 : i32
    return %c0_i32, %c0_i32_0 : i32, i32
  }
}

</mosaic_0001>

<bundles_post_ra>
// kernel: tpu_custom_call.1
= control target key start
LH: loop header
LB: loop body
LE: loop exit
PB: predicated region body
PF: predicated region fallthrough
CT: control target
= control target key end

     0   :  { %11 = vsyncpa [#allocation4], 0  ;;  %s2693_s0 = inlined_call_operand.hbm [shape: f32[8,16,16], index: 0, kind: input, shape index: {}]   ;;  %s2694_s1 = inlined_call_operand.hbm [shape: f32[8,16,16], index: 1, kind: input, shape index: {}]   ;;  %s2695_s2 = inlined_call_operand.hbm [shape: f32[1,1], index: 2, kind: output, shape index: {0}]   ;;  %s2696_s3 = inlined_call_operand.hbm [shape: f32[1,1], index: 3, kind: output, shape index: {1}]   ;;  %s2697_s4 = inlined_call_operand.hbm [shape: f32[1,1], index: 4, kind: output, shape index: {2}]   ;;  %s2698_s5 = inlined_call_operand.hbm [shape: f32[1,1], index: 5, kind: output, shape index: {3}]  }
   0x1   :  { %12 = vsyncpa [#allocation7], 0 }
   0x2   :  { %13 = vsyncpa [#allocation5], 0 }
   0x3   :  { %14 = vsyncpa [#allocation10], 0 }
   0x4   :  { %15 = vsyncpa [#allocation13], 0  ;;  %s20_s20 = sshll.u32 %s2693_s0, 4  ;;  %s1626_s21 = smov [#allocation3]   ;;  %s21_s20 = int_to_ptr.hbm [resolvable:$true] %s20_s20 }
   0x5   :  { %s22_s22 = sshll.u32 %s1626_s21, 4  ;;  %s33_s25 = sshll.u32 %s2694_s1, 4  ;;  %s23_s22 = int_to_ptr.vmem [resolvable:$true] %s22_s22  ;;  %s34_s25 = int_to_ptr.hbm [resolvable:$true] %s33_s25 }
   0x6   :  { %s1627_s26 = smov 128   ;;  %s1628_s27 = smov 8  }
   0x7   :  { %28 = dma.hbm_to_vmem [thread:$0]  %s21_s20, 2048, %s23_s22, [#allocation4], %s1627_s26, %s1627_s26, %s1628_s27  }
   0x8   :  { %s1629_s28 = smov [#allocation6]  }
   0x9   :  { %s35_s29 = sshll.u32 %s1629_s28, 4  ;;  %s36_s29 = int_to_ptr.vmem [resolvable:$true] %s35_s29 }
   0xa   :  { %41 = dma.hbm_to_vmem [thread:$0]  %s34_s25, 2048, %s36_s29, [#allocation7], %s1627_s26, %s1627_s26, %s1628_s27  }
   0xb   :  { %1616 = dma.done.wait [#allocation4], 2048  }
   0xc   :  { %1617 = vsyncadd [#allocation4], 4294965248 }
   0xd   :  { %1618 = dma.done.wait [#allocation7], 2048  }
   0xe   :  { %1619 = vsyncadd [#allocation7], 4294965248  ;;  %v52_v0 = vld [vmem:[#allocation3 + $0x10] sm:$0xff]  ;;  %v50_v2 = vld [vmem:[#allocation3] sm:$0xff]  ;;  %s1630_s0 = smov 2   ;;  %vm98_vm0 = vcmask 162816  }
   0xf   :  { %v68_v1 = vld [vmem:[#allocation6 + $0x10] sm:$0xff]  ;;  %v66_v4 = vld [vmem:[#allocation6] sm:$0xff]  ;;  %v53_v8 = vld [vmem:[#allocation3 + $0x18] sm:$0xff]  ;;  %v1631_v26 = vmov 0.0   ;;  %vm101_vm1 = vcmask 158720   ;;  %vm188_vm2 = vcmask 146448  }
  0x10   :  { %v1676_v3 = vsub.f32 %v52_v0, %v68_v1  ;;  %v1678_v5 = vsub.f32 %v50_v2, %v66_v4  ;;  %v54_v6 = vld [vmem:[#allocation3 + $0x20] sm:$0xff]  ;;  %v69_v9 = vld [vmem:[#allocation6 + $0x18] sm:$0xff]  ;;  %v51_v11 = vld [vmem:[#allocation3 + $0x8] sm:$0xff]  ;;  %103 = vst.msk [vmem:[#allocation2 + $0x18] sm:$0xff] %vm98_vm0, %v1631_v26  ;;  %s1632_s1 = smov 127   ;;  %s1633_s30 = smov 126  }
  0x11   :  { %v70_v7 = vld [vmem:[#allocation6 + $0x20] sm:$0xff]  ;;  %v67_v12 = vld [vmem:[#allocation6 + $0x8] sm:$0xff]  ;;  %v1688_v13 = vsub.f32 %v53_v8, %v69_v9  ;;  %v57_v18 = vld [vmem:[#allocation3 + $0x38] sm:$0xff]  ;;  %104 = vst.msk [vmem:[#allocation2 + $0x20] sm:$0xff] %vm98_vm0, %v1631_v26  ;;  %s1634_s6 = smov 125   ;;  %s1635_s7 = smov 124  }
  0x12   :  { %2731 = vst [vmem:[#allocation19_spill] sm:$0xff] %v1676_v3  ;;  %144 = vrot.lane.b32.xlu1 %v1676_v3, %s1630_s0  ;;  %140 = vrot.lane.b32.xlu0 %v1678_v5, %s1630_s0  ;;  %v1684_v10 = vsub.f32 %v54_v6, %v70_v7  ;;  %v55_v14 = vld [vmem:[#allocation3 + $0x28] sm:$0xff]  ;;  %v1690_v16 = vsub.f32 %v51_v11, %v67_v12  ;;  %v73_v19 = vld [vmem:[#allocation6 + $0x38] sm:$0xff]  ;;  %v56_v20 = vld [vmem:[#allocation3 + $0x30] sm:$0xff]  ;;  %vm1225_vm3 = vcmask 130048   ;;  %vm821_vm4 = vcmask 1046528  }
  0x13   :  { %2732 = vst [vmem:[#allocation20_spill] sm:$0xff] %v1678_v5  ;;  %v71_v15 = vld [vmem:[#allocation6 + $0x28] sm:$0xff]  ;;  %v72_v21 = vld [vmem:[#allocation6 + $0x30] sm:$0xff]  ;;  %v1700_v22 = vsub.f32 %v57_v18, %v73_v19  ;;  %v58_v23 = vld [vmem:[#allocation3 + $0x40] sm:$0xff]  ;;  %vm942_vm5 = vcmask 1045504   ;;  %vm1015_vm6 = vcmask 1044480  }
  0x14   :  { %2733 = vst [vmem:[#allocation21_spill] sm:$0xff] %v1684_v10  ;;  %148 = vrot.lane.b32.xlu2 %v1684_v10, %s1630_s0  ;;  %v1692_v17 = vsub.f32 %v55_v14, %v71_v15  ;;  %v74_v24 = vld [vmem:[#allocation6 + $0x40] sm:$0xff]  ;;  %v1702_v25 = vsub.f32 %v56_v20, %v72_v21  ;;  %v60_v28 = vld [vmem:[#allocation3 + $0x50] sm:$0xff]  ;;  %v59_v30 = vld [vmem:[#allocation3 + $0x48] sm:$0xff]  ;;  %vm1120_vm7 = vcmask 1043456   ;;  %s1636_s8 = smov [#allocation8]  }
  0x15   :  { %2734 = vst [vmem:[#allocation22_spill] sm:$0xff] %v1688_v13  ;;  %v1705_v27 = vsub.f32 %v58_v23, %v74_v24  ;;  %v76_v29 = vld [vmem:[#allocation6 + $0x50] sm:$0xff]  ;;  %v75_v31 = vld [vmem:[#allocation6 + $0x48] sm:$0xff]  ;;  %v61_v33 = vld [vmem:[#allocation3 + $0x58] sm:$0xff]  ;;  %s1398_s9 = sshll.u32 %s1636_s8, 4  ;;  %s1400_s12 = sshll.u32 %s2695_s2, 4  ;;  %s1399_s9 = int_to_ptr.vmem [resolvable:$true] %s1398_s9  ;;  %s1401_s12 = int_to_ptr.hbm [resolvable:$true] %s1400_s12 }
  0x16   :  { %2735 = vst [vmem:[#allocation23_spill] sm:$0xff] %v1690_v16  ;;  %v1718_v32 = vsub.f32 %v60_v28, %v76_v29  ;;  %v77_v34 = vld [vmem:[#allocation6 + $0x58] sm:$0xff]  ;;  %v1721_v35 = vsub.f32 %v59_v30, %v75_v31  ;;  %v63_v37 = vld [vmem:[#allocation3 + $0x68] sm:$0xff]  ;;  %v62_v39 = vld [vmem:[#allocation3 + $0x60] sm:$0xff]  ;;  %vm1387_vm8 = vcmask 0   ;;  %s1637_s13 = smov [#allocation12]  }
  0x17   :  { %2736 = vst [vmem:[#allocation24_spill] sm:$0xff] %v1692_v17  ;;  %v1725_v36 = vsub.f32 %v61_v33, %v77_v34  ;;  %v79_v38 = vld [vmem:[#allocation6 + $0x68] sm:$0xff]  ;;  %v78_v40 = vld [vmem:[#allocation6 + $0x60] sm:$0xff]  ;;  %v64_v42 = vld [vmem:[#allocation3 + $0x70] sm:$0xff]  ;;  %s1431_s14 = sshll.u32 %s1637_s13, 4  ;;  %s1433_s17 = sshll.u32 %s2698_s5, 4  ;;  %s1432_s14 = int_to_ptr.vmem [resolvable:$true] %s1431_s14  ;;  %s1434_s17 = int_to_ptr.hbm [resolvable:$true] %s1433_s17 }
  0x18   :  { %2737 = vst [vmem:[#allocation25_spill] sm:$0xff] %v1700_v22  ;;  %v1738_v41 = vsub.f32 %v63_v37, %v79_v38  ;;  %v80_v43 = vld [vmem:[#allocation6 + $0x70] sm:$0xff]  ;;  %v1741_v44 = vsub.f32 %v62_v39, %v78_v40  ;;  %v65_v46 = vld [vmem:[#allocation3 + $0x78] sm:$0xff]  ;;  %s1638_s18 = smov [#allocation9]   ;;  %s1411_s21 = sshll.u32 %s2696_s3, 4  ;;  %s1412_s21 = int_to_ptr.hbm [resolvable:$true] %s1411_s21 }
  0x19   :  { %2738 = vst [vmem:[#allocation26_spill] sm:$0xff] %v1702_v25  ;;  %v1744_v45 = vsub.f32 %v64_v42, %v80_v43  ;;  %v81_v47 = vld [vmem:[#allocation6 + $0x78] sm:$0xff]  ;;  %s1409_s19 = sshll.u32 %s1638_s18, 4  ;;  %s1639_s22 = smov [#allocation11]   ;;  %s1410_s19 = int_to_ptr.vmem [resolvable:$true] %s1409_s19 }
  0x1a   :  { %146 = vrot.lane.b32.xlu1 %v1688_v13, %s1630_s0  ;;  %142 = vrot.lane.b32.xlu0 %v1690_v16, %s1630_s0  ;;  %2739 = vst [vmem:[#allocation27_spill] sm:$0xff] %v1705_v27  ;;  %v1752_v48 = vsub.f32 %v65_v46, %v81_v47  ;;  %s1420_s23 = sshll.u32 %s1639_s22, 4  ;;  %s1422_s26 = sshll.u32 %s2697_s4, 4  ;;  %s1421_s23 = int_to_ptr.vmem [resolvable:$true] %s1420_s23  ;;  %s1423_s26 = int_to_ptr.hbm [resolvable:$true] %s1422_s26 }
  0x1b   :  { %99 = vst.msk [vmem:[#allocation2] sm:$0xff] %vm98_vm0, %v1631_v26 }
  0x1c   :  { %150 = vrot.lane.b32.xlu2 %v1692_v17, %s1630_s0  ;;  %100 = vst.msk [vmem:[#allocation2 + $0x8] sm:$0xff] %vm98_vm0, %v1631_v26 }
  0x1d   :  { %106 = vst.msk [vmem:[#allocation2 + $0x30] sm:$0xff] %vm98_vm0, %v1631_v26 }
  0x1e   :  { %107 = vst.msk [vmem:[#allocation2 + $0x38] sm:$0xff] %vm98_vm0, %v1631_v26 }
  0x1f   :  { %2740 = vst [vmem:[#allocation28_spill] sm:$0xff] %v1718_v32 }
  0x20   :  { %109 = vst.msk [vmem:[#allocation2 + $0x48] sm:$0xff] %vm98_vm0, %v1631_v26 }
  0x21   :  { %2741 = vst [vmem:[#allocation29_spill] sm:$0xff] %v1721_v35 }
  0x22   :  { %154 = vrot.lane.b32.xlu1 %v1700_v22, %s1630_s0  ;;  %152 = vrot.lane.b32.xlu0 %v1702_v25, %s1630_s0  ;;  %110 = vst.msk [vmem:[#allocation2 + $0x50] sm:$0xff] %vm98_vm0, %v1631_v26 }
  0x23   :  { %112 = vst.msk [vmem:[#allocation2 + $0x60] sm:$0xff] %vm98_vm0, %v1631_v26 }
  0x24   :  { %156 = vrot.lane.b32.xlu2 %v1705_v27, %s1630_s0  ;;  %2742 = vst [vmem:[#allocation30_spill] sm:$0xff] %v1725_v36 }
  0x25   :  { %113 = vst.msk [vmem:[#allocation2 + $0x68] sm:$0xff] %vm98_vm0, %v1631_v26 }
  0x26   :  { %115 = vst.msk [vmem:[#allocation2 + $0x78] sm:$0xff] %vm98_vm0, %v1631_v26 }
  0x27   :  { %116 = vst.msk [vmem:[#allocation2 + $0x80] sm:$0xff] %vm98_vm0, %v1631_v26 }
  0x28   :  { %118 = vst.msk [vmem:[#allocation2 + $0x90] sm:$0xff] %vm98_vm0, %v1631_v26 }
  0x29   :  { %119 = vst.msk [vmem:[#allocation2 + $0x98] sm:$0xff] %vm98_vm0, %v1631_v26 }
  0x2a   :  { %160 = vrot.lane.b32.xlu1 %v1718_v32, %s1630_s0  ;;  %158 = vrot.lane.b32.xlu0 %v1721_v35, %s1630_s0  ;;  %2743 = vst [vmem:[#allocation31_spill] sm:$0xff] %v1738_v41 }
  0x2b   :  { %121 = vst.msk [vmem:[#allocation2 + $0xa8] sm:$0xff] %vm98_vm0, %v1631_v26 }
  0x2c   :  { %162 = vrot.lane.b32.xlu2 %v1725_v36, %s1630_s0  ;;  %2744 = vst [vmem:[#allocation32_spill] sm:$0xff] %v1741_v44 }
  0x2d   :  { %122 = vst.msk [vmem:[#allocation2 + $0xb0] sm:$0xff] %vm98_vm0, %v1631_v26 }
  0x2e   :  { %2745 = vst [vmem:[#allocation33_spill] sm:$0xff] %v1744_v45 }
  0x2f   :  { %2746 = vst [vmem:[#allocation34_spill] sm:$0xff] %v1752_v48 }
  0x30   :  { %105 = vst.msk [vmem:[#allocation2 + $0x28] sm:$0xf] %vm101_vm1, %v1631_v26 }
  0x31   :  { %102 = vst.msk [vmem:[#allocation2 + $0x10] sm:$0xf] %vm101_vm1, %v1631_v26 }
  0x32   :  { %166 = vrot.lane.b32.xlu1 %v1738_v41, %s1630_s0  ;;  %164 = vrot.lane.b32.xlu0 %v1741_v44, %s1630_s0  ;;  %108 = vst.msk [vmem:[#allocation2 + $0x40] sm:$0xf] %vm101_vm1, %v1631_v26 }
  0x33   :  { %111 = vst.msk [vmem:[#allocation2 + $0x58] sm:$0xf] %vm101_vm1, %v1631_v26 }
  0x34   :  { %168 = vrot.lane.b32.xlu2 %v1744_v45, %s1630_s0  ;;  %114 = vst.msk [vmem:[#allocation2 + $0x70] sm:$0xf] %vm101_vm1, %v1631_v26 }
  0x35   :  { %117 = vst.msk [vmem:[#allocation2 + $0x88] sm:$0xf] %vm101_vm1, %v1631_v26 }
  0x36   :  { %120 = vst.msk [vmem:[#allocation2 + $0xa0] sm:$0xf] %vm101_vm1, %v1631_v26 }
  0x37   :  { %123 = vst.msk [vmem:[#allocation2 + $0xb8] sm:$0xf] %vm101_vm1, %v1631_v26 }
  0x3a   :  { %170 = vrot.lane.b32.xlu0 %v1752_v48, %s1630_s0 }
  0x6e   :  { %v149_v49 = vpop.permute.xlu2 %148 }
  0x6f   :  { %193 = vst.msk [vmem:[#allocation2 + $0x32] sm:$0xff] %vm188_vm2, %v149_v49 }
  0x76   :  { %v151_v50 = vpop.permute.xlu2 %150  ;;  %v1794_v4 = vld [vmem:[#allocation2 + $0x30] sm:$0xff] }
  0x77   :  { %194 = vst.msk [vmem:[#allocation2 + $0x3a] sm:$0xff] %vm188_vm2, %v151_v50  ;;  %v1800_v8 = vmul.f32 0.23388076, %v1794_v4 }
  0x7e   :  { %v157_v51 = vpop.permute.xlu2 %156  ;;  %v1818_v18 = vld [vmem:[#allocation2 + $0x40] sm:$0xf]  ;;  %v1825_v21 = vld [vmem:[#allocation2 + $0x38] sm:$0xff] }
  0x7f   :  { %197 = vst.msk [vmem:[#allocation2 + $0x62] sm:$0xff] %vm188_vm2, %v157_v51  ;;  %v1823_v20 = vmul.f32 0.23388076, %v1818_v18  ;;  %v1833_v28 = vmul.f32 0.23388076, %v1825_v21 }
  0x84   :  { %v145_v52 = vpop.permute.xlu1 %144  ;;  %v141_v53 = vpop.permute.xlu0 %140 }
  0x85   :  { %191 = vst.msk [vmem:[#allocation2 + $0x1a] sm:$0xff] %vm188_vm2, %v145_v52 }
  0x86   :  { %189 = vst.msk [vmem:[#allocation2 + $0x2] sm:$0xff] %vm188_vm2, %v141_v53  ;;  %v163_v59 = vpop.permute.xlu2 %162  ;;  %v1843_v30 = vld [vmem:[#allocation2 + $0x60] sm:$0xff] }
  0x87   :  { %200 = vst.msk [vmem:[#allocation2 + $0x82] sm:$0xff] %vm188_vm2, %v163_v59  ;;  %v1851_v34 = vmul.f32 0.23388076, %v1843_v30 }
  0x8c   :  { %v147_v54 = vpop.permute.xlu1 %146  ;;  %v143_v55 = vpop.permute.xlu0 %142  ;;  %v1770_v58 = vld [vmem:[#allocation2 + $0x18] sm:$0xff] }
  0x8d   :  { %192 = vst.msk [vmem:[#allocation2 + $0x22] sm:$0xff] %vm188_vm2, %v147_v54  ;;  %v1762_v56 = vld [vmem:[#allocation2] sm:$0xff]  ;;  %v1774_v60 = vmul.f32 0.23388076, %v1770_v58  ;;  %v400_v36 = vmul.f32 0.2920817, %v1770_v58 }
  0x8e   :  { %190 = vst.msk [vmem:[#allocation2 + $0xa] sm:$0xff] %vm188_vm2, %v143_v55  ;;  %v1766_v57 = vmul.f32 0.23388076, %v1762_v56  ;;  %v169_v7 = vpop.permute.xlu2 %168  ;;  %v1884_v49 = vld [vmem:[#allocation2 + $0x88] sm:$0xf] }
  0x8f   :  { %203 = vst.msk [vmem:[#allocation2 + $0xaa] sm:$0xff] %vm188_vm2, %v169_v7  ;;  %v1891_v52 = vmul.f32 0.23388076, %v1884_v49  ;;  %v397_v45 = vmul.f32 0.2920817, %v1762_v56 }
  0x90   :  { %301 = vrot.lane.b32.xlu1 %v1766_v57, %s1632_s1 }
  0x94   :  { %v155_v61 = vpop.permute.xlu1 %154  ;;  %v153_v0 = vpop.permute.xlu0 %152  ;;  %v1796_v6 = vld [vmem:[#allocation2 + $0x28] sm:$0xf]  ;;  %v1805_v11 = vld [vmem:[#allocation2 + $0x20] sm:$0xff] }
  0x95   :  { %v1776_v62 = vld [vmem:[#allocation2 + $0x10] sm:$0xf]  ;;  %v1778_v63 = vld [vmem:[#allocation2 + $0x8] sm:$0xff]  ;;  %196 = vst.msk [vmem:[#allocation2 + $0x52] sm:$0xff] %vm188_vm2, %v155_v61  ;;  %v1803_v9 = vmul.f32 0.23388076, %v1796_v6 }
  0x96   :  { %v1782_v1 = vmul.f32 0.23388076, %v1776_v62  ;;  %v1785_v2 = vmul.f32 0.23388076, %v1778_v63  ;;  %195 = vst.msk [vmem:[#allocation2 + $0x4a] sm:$0xff] %vm188_vm2, %v153_v0  ;;  %v1907_v59 = vld [vmem:[#allocation2 + $0xa8] sm:$0xff] }
  0x97   :  { %v1810_v15 = vmul.f32 0.23388076, %v1805_v11  ;;  %v1915_v7 = vmul.f32 0.23388076, %v1907_v59  ;;  %v399_v48 = vmul.f32 0.2920817, %v1776_v62 }
  0x98   :  { %307 = vrot.lane.b32.xlu1 %v1774_v60, %s1632_s1  ;;  %305 = vrot.lane.b32.xlu0 %v1782_v1, %s1632_s1  ;;  %v398_v41 = vmul.f32 0.2920817, %v1778_v63  ;;  %v402_v44 = vmul.f32 0.2920817, %v1796_v6  ;;  %v401_v35 = vmul.f32 0.2920817, %v1805_v11 }
  0x99   :  { %303 = vrot.lane.b32.xlu2 %v1785_v2, %s1632_s1 }
  0x9c   :  { %v161_v12 = vpop.permute.xlu1 %160  ;;  %v159_v14 = vpop.permute.xlu0 %158  ;;  %v1841_v29 = vld [vmem:[#allocation2 + $0x58] sm:$0xf] }
  0x9d   :  { %199 = vst.msk [vmem:[#allocation2 + $0x7a] sm:$0xff] %vm188_vm2, %v161_v12  ;;  %v1820_v19 = vld [vmem:[#allocation2 + $0x48] sm:$0xff]  ;;  %v1845_v31 = vld [vmem:[#allocation2 + $0x50] sm:$0xff]  ;;  %v1848_v33 = vmul.f32 0.23388076, %v1841_v29 }
  0x9e   :  { %198 = vst.msk [vmem:[#allocation2 + $0x6a] sm:$0xff] %vm188_vm2, %v159_v14  ;;  %v1828_v23 = vmul.f32 0.23388076, %v1820_v19  ;;  %v1854_v37 = vmul.f32 0.23388076, %v1845_v31 }
  0x9f   :  { %v406_v32 = vmul.f32 0.2920817, %v1820_v19 }
  0xa0   :  { %313 = vrot.lane.b32.xlu1 %v1800_v8, %s1632_s1  ;;  %311 = vrot.lane.b32.xlu0 %v1803_v9, %s1632_s1 }
  0xa1   :  { %309 = vrot.lane.b32.xlu2 %v1810_v15, %s1632_s1 }
  0xa4   :  { %v167_v24 = vpop.permute.xlu1 %166  ;;  %v165_v26 = vpop.permute.xlu0 %164  ;;  %v1863_v39 = vld [vmem:[#allocation2 + $0x78] sm:$0xff]  ;;  %v1888_v51 = vld [vmem:[#allocation2 + $0x80] sm:$0xff] }
  0xa5   :  { %202 = vst.msk [vmem:[#allocation2 + $0x9a] sm:$0xff] %vm188_vm2, %v167_v24  ;;  %v1865_v40 = vld [vmem:[#allocation2 + $0x70] sm:$0xf]  ;;  %v1867_v42 = vld [vmem:[#allocation2 + $0x68] sm:$0xff]  ;;  %v1870_v43 = vmul.f32 0.23388076, %v1863_v39 }
  0xa6   :  { %201 = vst.msk [vmem:[#allocation2 + $0x92] sm:$0xff] %vm188_vm2, %v165_v26  ;;  %v1873_v46 = vmul.f32 0.23388076, %v1865_v40  ;;  %v1876_v47 = vmul.f32 0.23388076, %v1867_v42 }
  0xa7   :  { %v1897_v54 = vmul.f32 0.23388076, %v1888_v51  ;;  %v411_v27 = vmul.f32 0.2920817, %v1865_v40  ;;  %v410_v22 = vmul.f32 0.2920817, %v1867_v42 }
  0xa8   :  { %317 = vrot.lane.b32.xlu0 %v1823_v20, %s1632_s1  ;;  %319 = vrot.lane.b32.xlu1 %v1828_v23, %s1632_s1  ;;  %v413_v25 = vmul.f32 0.2920817, %v1888_v51 }
  0xa9   :  { %315 = vrot.lane.b32.xlu2 %v1833_v28, %s1632_s1 }
  0xac   :  { %v171_v38 = vpop.permute.xlu0 %170  ;;  %v1905_v55 = vld [vmem:[#allocation2 + $0xa0] sm:$0xf] }
  0xad   :  { %204 = vst.msk [vmem:[#allocation2 + $0xb2] sm:$0xff] %vm188_vm2, %v171_v38  ;;  %v1886_v50 = vld [vmem:[#allocation2 + $0x90] sm:$0xff]  ;;  %v1909_v61 = vld [vmem:[#allocation2 + $0x98] sm:$0xff]  ;;  %v1912_v0 = vmul.f32 0.23388076, %v1905_v55 }
  0xae   :  { %v1894_v53 = vmul.f32 0.23388076, %v1886_v50  ;;  %v1918_v12 = vmul.f32 0.23388076, %v1909_v61  ;;  %v417_v17 = vmul.f32 0.2920817, %v1905_v55 }
  0xaf   :  { %v416_v10 = vmul.f32 0.2920817, %v1909_v61 }
  0xb0   :  { %323 = vrot.lane.b32.xlu0 %v1848_v33, %s1632_s1  ;;  %325 = vrot.lane.b32.xlu1 %v1851_v34, %s1632_s1 }
  0xb1   :  { %321 = vrot.lane.b32.xlu2 %v1854_v37, %s1632_s1 }
  0xb4   :  { %v1926_v14 = vld [vmem:[#allocation2 + $0xb8] sm:$0xf]  ;;  %v1928_v24 = vld [vmem:[#allocation2 + $0xb0] sm:$0xff] }
  0xb5   :  { %v1931_v26 = vmul.f32 0.23388076, %v1926_v14  ;;  %v1934_v38 = vmul.f32 0.23388076, %v1928_v24  ;;  %v420_v5 = vmul.f32 0.2920817, %v1926_v14 }
  0xb8   :  { %331 = vrot.lane.b32.xlu1 %v1870_v43, %s1632_s1  ;;  %329 = vrot.lane.b32.xlu0 %v1873_v46, %s1632_s1 }
  0xb9   :  { %327 = vrot.lane.b32.xlu2 %v1876_v47, %s1632_s1 }
  0xc0   :  { %335 = vrot.lane.b32.xlu0 %v1891_v52, %s1632_s1  ;;  %337 = vrot.lane.b32.xlu1 %v1894_v53, %s1632_s1 }
  0xc1   :  { %333 = vrot.lane.b32.xlu2 %v1897_v54, %s1632_s1 }
  0xc8   :  { %341 = vrot.lane.b32.xlu0 %v1912_v0, %s1632_s1  ;;  %343 = vrot.lane.b32.xlu1 %v1915_v7, %s1632_s1 }
  0xc9   :  { %339 = vrot.lane.b32.xlu2 %v1918_v12, %s1632_s1 }
  0xd0   :  { %445 = vrot.lane.b32.xlu1 %v397_v45, %s1633_s30  ;;  %347 = vrot.lane.b32.xlu0 %v1931_v26, %s1632_s1  ;;  %v403_v45 = vmul.f32 0.2920817, %v1794_v4 }
  0xd1   :  { %345 = vrot.lane.b32.xlu2 %v1934_v38, %s1632_s1 }
  0xd8   :  { %451 = vrot.lane.b32.xlu1 %v400_v36, %s1633_s30  ;;  %449 = vrot.lane.b32.xlu0 %v399_v48, %s1633_s30  ;;  %v405_v36 = vmul.f32 0.2920817, %v1818_v18  ;;  %v404_v48 = vmul.f32 0.2920817, %v1825_v21 }
  0xd9   :  { %447 = vrot.lane.b32.xlu2 %v398_v41, %s1633_s30  ;;  %v409_v41 = vmul.f32 0.2920817, %v1843_v30 }
  0xe0   :  { %457 = vrot.lane.b32.xlu1 %v403_v45, %s1633_s30  ;;  %455 = vrot.lane.b32.xlu0 %v402_v44, %s1633_s30  ;;  %v408_v45 = vmul.f32 0.2920817, %v1841_v29  ;;  %v407_v44 = vmul.f32 0.2920817, %v1845_v31 }
  0xe1   :  { %453 = vrot.lane.b32.xlu2 %v401_v35, %s1633_s30  ;;  %v1967_v35 = vmul.f32 0.120078385, %v1778_v63 }
  0xe8   :  { %463 = vrot.lane.b32.xlu1 %v406_v32, %s1633_s30  ;;  %461 = vrot.lane.b32.xlu0 %v405_v36, %s1633_s30 }
  0xe9   :  { %459 = vrot.lane.b32.xlu2 %v404_v48, %s1633_s30  ;;  %v412_v48 = vmul.f32 0.2920817, %v1863_v39 }
  0xf0   :  { %469 = vrot.lane.b32.xlu1 %v409_v41, %s1633_s30  ;;  %467 = vrot.lane.b32.xlu0 %v408_v45, %s1633_s30  ;;  %v1979_v41 = vmul.f32 0.120078385, %v1805_v11 }
  0xf1   :  { %465 = vrot.lane.b32.xlu2 %v407_v44, %s1633_s30  ;;  %v415_v44 = vmul.f32 0.2920817, %v1886_v50 }
  0xf3   :  { %v304_v32 = vpop.permute.xlu2 %303 }
  0xf4   :  { %v1970_v36 = vadd.f32 %v304_v32, %v1967_v35  ;;  %v414_v32 = vmul.f32 0.2920817, %v1884_v49 }
  0xf8   :  { %475 = vrot.lane.b32.xlu1 %v412_v48, %s1633_s30  ;;  %473 = vrot.lane.b32.xlu0 %v411_v27, %s1633_s30 }
  0xf9   :  { %471 = vrot.lane.b32.xlu2 %v410_v22, %s1633_s30  ;;  %v229_v22 = vmul.f32 0.120078385, %v1762_v56  ;;  %v231_v56 = vmul.f32 0.120078385, %v1776_v62 }
  0xfb   :  { %v310_v63 = vpop.permute.xlu2 %309 }
  0xfc   :  { %v1982_v45 = vadd.f32 %v310_v63, %v1979_v41  ;;  %v418_v63 = vmul.f32 0.2920817, %v1907_v59 }
 0x100   :  { %481 = vrot.lane.b32.xlu1 %v415_v44, %s1633_s30  ;;  %479 = vrot.lane.b32.xlu0 %v414_v32, %s1633_s30 }
 0x101   :  { %477 = vrot.lane.b32.xlu2 %v413_v25, %s1633_s30  ;;  %v232_v25 = vmul.f32 0.120078385, %v1770_v58 }
 0x102   :  { %v302_v27 = vpop.permute.xlu1 %301 }
 0x103   :  { %v1991_v11 = vadd.f32 %v302_v27, %v229_v22  ;;  %v1993_v48 = vpop.permute.xlu2 %315 }
 0x108   :  { %487 = vrot.lane.b32.xlu1 %v418_v63, %s1633_s30  ;;  %485 = vrot.lane.b32.xlu0 %v417_v17, %s1633_s30  ;;  %v419_v63 = vmul.f32 0.2920817, %v1928_v24  ;;  %v234_v17 = vmul.f32 0.120078385, %v1796_v6 }
 0x109   :  { %483 = vrot.lane.b32.xlu2 %v416_v10, %s1633_s30  ;;  %v235_v10 = vmul.f32 0.120078385, %v1794_v4 }
 0x10a   :  { %v308_v44 = vpop.permute.xlu1 %307  ;;  %v306_v32 = vpop.permute.xlu0 %305 }
 0x10b   :  { %v2003_v27 = vadd.f32 %v308_v44, %v232_v25  ;;  %v2005_v16 = vpop.permute.xlu2 %321  ;;  %v2007_v13 = vadd.f32 %v306_v32, %v231_v56 }
 0x110   :  { %541 = vrot.lane.b32.xlu1 %v1766_v57, %s1634_s6  ;;  %491 = vrot.lane.b32.xlu0 %v420_v5, %s1633_s30  ;;  %v238_v5 = vmul.f32 0.120078385, %v1820_v19  ;;  %v237_v57 = vmul.f32 0.120078385, %v1818_v18 }
 0x111   :  { %489 = vrot.lane.b32.xlu2 %v419_v63, %s1633_s30 }
 0x112   :  { %v314_v58 = vpop.permute.xlu1 %313  ;;  %v312_v62 = vpop.permute.xlu0 %311 }
 0x113   :  { %v2017_v44 = vadd.f32 %v314_v58, %v235_v10  ;;  %v2019_v32 = vpop.permute.xlu2 %327  ;;  %v2021_v3 = vadd.f32 %v312_v62, %v234_v17 }
 0x118   :  { %547 = vrot.lane.b32.xlu1 %v1774_v60, %s1634_s6  ;;  %545 = vrot.lane.b32.xlu0 %v1782_v1, %s1634_s6  ;;  %v2044_v60 = vmul.f32 0.120078385, %v1843_v30  ;;  %v240_v1 = vmul.f32 0.120078385, %v1841_v29 }
 0x119   :  { %543 = vrot.lane.b32.xlu2 %v1785_v2, %s1634_s6 }
 0x11a   :  { %v320_v4 = vpop.permute.xlu1 %319  ;;  %v318_v6 = vpop.permute.xlu0 %317 }
 0x11b   :  { %v2031_v63 = vadd.f32 %v320_v4, %v238_v5  ;;  %v2033_v58 = vpop.permute.xlu2 %333  ;;  %v2035_v62 = vadd.f32 %v318_v6, %v237_v57 }
 0x120   :  { %553 = vrot.lane.b32.xlu1 %v1800_v8, %s1634_s6  ;;  %551 = vrot.lane.b32.xlu0 %v1803_v9, %s1634_s6  ;;  %v2061_v8 = vmul.f32 0.120078385, %v1865_v40 }
 0x121   :  { %549 = vrot.lane.b32.xlu2 %v1810_v15, %s1634_s6 }
 0x122   :  { %v326_v2 = vpop.permute.xlu1 %325  ;;  %v324_v18 = vpop.permute.xlu0 %323 }
 0x123   :  { %v2048_v19 = vadd.f32 %v326_v2, %v2044_v60  ;;  %v2050_v4 = vpop.permute.xlu2 %339  ;;  %v2052_v6 = vadd.f32 %v324_v18, %v240_v1  ;;  %v236_v18 = vmul.f32 0.120078385, %v1825_v21  ;;  %v239_v21 = vmul.f32 0.120078385, %v1845_v31 }
 0x124   :  { %v242_v31 = vmul.f32 0.120078385, %v1867_v42 }
 0x128   :  { %559 = vrot.lane.b32.xlu1 %v1828_v23, %s1634_s6  ;;  %557 = vrot.lane.b32.xlu0 %v1823_v20, %s1634_s6 }
 0x129   :  { %555 = vrot.lane.b32.xlu2 %v1833_v28, %s1634_s6 }
 0x12a   :  { %v2063_v9 = vpop.permute.xlu1 %331  ;;  %v330_v15 = vpop.permute.xlu0 %329 }
 0x12b   :  { %v2065_v29 = vpop.permute.xlu2 %345  ;;  %v2068_v30 = vadd.f32 %v330_v15, %v2061_v8 }
 0x130   :  { %665 = vrot.lane.b32.xlu1 %v231_v56, %s1635_s7  ;;  %663 = vrot.lane.b32.xlu0 %v1967_v35, %s1635_s7 }
 0x131   :  { %661 = vrot.lane.b32.xlu2 %v229_v22, %s1635_s7 }
 0x132   :  { %v2074_v20 = vpop.permute.xlu1 %337  ;;  %v2076_v23 = vpop.permute.xlu0 %335 }
 0x133   :  { %v448_v28 = vpop.permute.xlu2 %447 }
 0x134   :  { %v2079_v40 = vadd.f32 %v448_v28, %v1970_v36  ;;  %v380_v36 = vadd.f32 %v1993_v48, %v236_v18 }
 0x138   :  { %671 = vrot.lane.b32.xlu1 %v234_v17, %s1635_s7  ;;  %669 = vrot.lane.b32.xlu0 %v1979_v41, %s1635_s7 }
 0x139   :  { %667 = vrot.lane.b32.xlu2 %v232_v25, %s1635_s7 }
 0x13a   :  { %v2085_v56 = vpop.permute.xlu1 %343  ;;  %v2087_v35 = vpop.permute.xlu0 %341 }
 0x13b   :  { %v454_v22 = vpop.permute.xlu2 %453 }
 0x13c   :  { %v2090_v2 = vadd.f32 %v454_v22, %v1982_v45 }
 0x140   :  { %673 = vrot.lane.b32.xlu1 %v235_v10, %s1635_s7  ;;  %563 = vrot.lane.b32.xlu0 %v1848_v33, %s1634_s6  ;;  %v383_v33 = vadd.f32 %v2005_v16, %v239_v21  ;;  %v386_v16 = vadd.f32 %v2019_v32, %v242_v31 }
 0x141   :  { %561 = vrot.lane.b32.xlu2 %v1854_v37, %s1634_s6 }
 0x142   :  { %v446_v41 = vpop.permute.xlu1 %445  ;;  %v2099_v25 = vpop.permute.xlu0 %347 }
 0x143   :  { %v2102_v17 = vadd.f32 %v446_v41, %v1991_v11  ;;  %v460_v45 = vpop.permute.xlu2 %459 }
 0x144   :  { %v2104_v15 = vadd.f32 %v460_v45, %v380_v36 }
 0x148   :  { %565 = vrot.lane.b32.xlu1 %v1851_v34, %s1634_s6  ;;  %677 = vrot.lane.b32.xlu0 %v237_v57, %s1635_s7 }
 0x149   :  { %675 = vrot.lane.b32.xlu2 %v236_v18, %s1635_s7 }
 0x14a   :  { %v452_v37 = vpop.permute.xlu1 %451  ;;  %v450_v48 = vpop.permute.xlu0 %449 }
 0x14b   :  { %v2113_v10 = vadd.f32 %v452_v37, %v2003_v27  ;;  %v466_v11 = vpop.permute.xlu2 %465  ;;  %v2116_v28 = vadd.f32 %v450_v48, %v2007_v13 }
 0x14c   :  { %v2118_v22 = vadd.f32 %v466_v11, %v383_v33 }
 0x150   :  { %679 = vrot.lane.b32.xlu1 %v238_v5, %s1635_s7  ;;  %569 = vrot.lane.b32.xlu0 %v1873_v46, %s1634_s6  ;;  %v245_v5 = vmul.f32 0.120078385, %v1888_v51  ;;  %v248_v51 = vmul.f32 0.120078385, %v1909_v61 }
 0x151   :  { %567 = vrot.lane.b32.xlu2 %v1876_v47, %s1634_s6 }
 0x152   :  { %v458_v34 = vpop.permute.xlu1 %457  ;;  %v456_v27 = vpop.permute.xlu0 %455  ;;  %v389_v46 = vadd.f32 %v2033_v58, %v245_v5 }
 0x153   :  { %v2128_v57 = vadd.f32 %v458_v34, %v2017_v44  ;;  %v472_v13 = vpop.permute.xlu2 %471  ;;  %v2131_v18 = vadd.f32 %v456_v27, %v2021_v3 }
 0x154   :  { %v2133_v42 = vadd.f32 %v472_v13, %v386_v16 }
 0x158   :  { %571 = vrot.lane.b32.xlu1 %v1870_v43, %s1634_s6  ;;  %683 = vrot.lane.b32.xlu0 %v240_v1, %s1635_s7  ;;  %v392_v43 = vadd.f32 %v2050_v4, %v248_v51 }
 0x159   :  { %681 = vrot.lane.b32.xlu2 %v239_v21, %s1635_s7 }
 0x15a   :  { %v464_v47 = vpop.permute.xlu1 %463  ;;  %v462_v44 = vpop.permute.xlu0 %461 }
 0x15b   :  { %v2142_v32 = vadd.f32 %v464_v47, %v2031_v63  ;;  %v478_v3 = vpop.permute.xlu2 %477  ;;  %v2145_v36 = vadd.f32 %v462_v44, %v2035_v62  ;;  %v2751_v44 = vld [vmem:[#allocation19_spill] sm:$0xff] }
 0x15c   :  { %v2147_v41 = vadd.f32 %v478_v3, %v389_v46  ;;  %v1211_v3 = vand.u32 2147483647, %v2751_v44 }
 0x160   :  { %685 = vrot.lane.b32.xlu1 %v2044_v60, %s1635_s7  ;;  %575 = vrot.lane.b32.xlu0 %v1891_v52, %s1634_s6  ;;  %v244_v60 = vmul.f32 0.120078385, %v1863_v39  ;;  %v251_v52 = vmul.f32 0.120078385, %v1928_v24 }
 0x161   :  { %573 = vrot.lane.b32.xlu2 %v1897_v54, %s1634_s6 }
 0x162   :  { %v470_v63 = vpop.permute.xlu1 %469  ;;  %v468_v58 = vpop.permute.xlu0 %467  ;;  %v388_v54 = vadd.f32 %v2063_v9, %v244_v60 }
 0x163   :  { %v2158_v62 = vadd.f32 %v470_v63, %v2048_v19  ;;  %v484_v1 = vpop.permute.xlu2 %483  ;;  %v2161_v45 = vadd.f32 %v468_v58, %v2052_v6  ;;  %v395_v19 = vadd.f32 %v2065_v29, %v251_v52 }
 0x164   :  { %v2163_v61 = vadd.f32 %v484_v1, %v392_v43  ;;  %v2752_v43 = vld [vmem:[#allocation20_spill] sm:$0xff]  ;;  %v2754_v1 = vld [vmem:[#allocation23_spill] sm:$0xff] }
 0x165   :  { %v1209_v63 = vand.u32 2147483647, %v2752_v43 }
 0x168   :  { %577 = vrot.lane.b32.xlu1 %v1894_v53, %s1634_s6  ;;  %689 = vrot.lane.b32.xlu0 %v2061_v8, %s1635_s7  ;;  %v247_v53 = vmul.f32 0.120078385, %v1886_v50  ;;  %v246_v8 = vmul.f32 0.120078385, %v1884_v49 }
 0x169   :  { %687 = vrot.lane.b32.xlu2 %v242_v31, %s1635_s7  ;;  %v250_v31 = vmul.f32 0.120078385, %v1907_v59  ;;  %v252_v59 = vmul.f32 0.120078385, %v1926_v14 }
 0x16a   :  { %v476_v4 = vpop.permute.xlu1 %475  ;;  %v474_v6 = vpop.permute.xlu0 %473  ;;  %v391_v9 = vadd.f32 %v2074_v20, %v247_v53  ;;  %v390_v29 = vadd.f32 %v2076_v23, %v246_v8 }
 0x16b   :  { %v2174_v21 = vadd.f32 %v476_v4, %v388_v54  ;;  %v490_v33 = vpop.permute.xlu2 %489  ;;  %v2177_v39 = vadd.f32 %v474_v6, %v2068_v30 }
 0x16c   :  { %v2179_v24 = vadd.f32 %v490_v33, %v395_v19  ;;  %v2755_v19 = vld [vmem:[#allocation21_spill] sm:$0xff] }
 0x16d   :  { %v1213_v4 = vand.u32 2147483647, %v2755_v19 }
 0x16e   :  { %2747 = vst [vmem:[#allocation35_spill] sm:$0xff] %v2179_v24 }
 0x170   :  { %691 = vrot.lane.b32.xlu1 %v244_v60, %s1635_s7  ;;  %581 = vrot.lane.b32.xlu0 %v1912_v0, %s1634_s6  ;;  %v249_v0 = vmul.f32 0.120078385, %v1905_v55  ;;  %v1210_v60 = vand.u32 2147483647, %v2754_v1 }
 0x171   :  { %579 = vrot.lane.b32.xlu2 %v1918_v12, %s1634_s6  ;;  %v394_v12 = vadd.f32 %v2085_v56, %v250_v31 }
 0x172   :  { %v482_v30 = vpop.permute.xlu1 %481  ;;  %v480_v37 = vpop.permute.xlu0 %479  ;;  %v393_v20 = vadd.f32 %v2087_v35, %v249_v0 }
 0x173   :  { %v2190_v48 = vadd.f32 %v482_v30, %v391_v9  ;;  %v544_v11 = vpop.permute.xlu2 %543  ;;  %v2192_v50 = vadd.f32 %v480_v37, %v390_v29  ;;  %v1241_v29 = vsel %vm1225_vm3, %v1210_v60, 0.0  ;;  %v2756_v30 = vld [vmem:[#allocation24_spill] sm:$0xff] }
 0x174   :  { %v2195_v49 = vadd.f32 %v544_v11, %v2079_v40  ;;  %v1214_v37 = vand.u32 2147483647, %v2756_v30  ;;  %v2757_v11 = vld [vmem:[#allocation26_spill] sm:$0xff] }
 0x178   :  { %583 = vrot.lane.b32.xlu1 %v1915_v7, %s1634_s6  ;;  %695 = vrot.lane.b32.xlu0 %v246_v8, %s1635_s7  ;;  %v396_v7 = vadd.f32 %v2099_v25, %v252_v59 }
 0x179   :  { %693 = vrot.lane.b32.xlu2 %v245_v5, %s1635_s7 }
 0x17a   :  { %v488_v23 = vpop.permute.xlu1 %487  ;;  %v486_v16 = vpop.permute.xlu0 %485 }
 0x17b   :  { %v2205_v34 = vadd.f32 %v488_v23, %v394_v12  ;;  %v550_v40 = vpop.permute.xlu2 %549  ;;  %v2207_v27 = vadd.f32 %v486_v16, %v393_v20  ;;  %v1244_v16 = vsel %vm1225_vm3, %v1214_v37, 0.0  ;;  %v2766_v37 = vld [vmem:[#allocation30_spill] sm:$0xff] }
 0x17c   :  { %v2210_v55 = vadd.f32 %v550_v40, %v2090_v2 }
 0x17d   :  { %2748 = vst [vmem:[#allocation36_spill] sm:$0xff] %v2205_v34 }
 0x17e   :  { %2749 = vst [vmem:[#allocation37_spill] sm:$0xff] %v2207_v27 }
 0x180   :  { %697 = vrot.lane.b32.xlu1 %v247_v53, %s1635_s7  ;;  %587 = vrot.lane.b32.xlu0 %v1931_v26, %s1634_s6 }
 0x181   :  { %585 = vrot.lane.b32.xlu2 %v1934_v38, %s1634_s6 }
 0x182   :  { %v542_v56 = vpop.permute.xlu1 %541  ;;  %v492_v35 = vpop.permute.xlu0 %491 }
 0x183   :  { %v613_v13 = vadd.f32 %v542_v56, %v2102_v17  ;;  %v556_v5 = vpop.permute.xlu2 %555  ;;  %v2220_v46 = vadd.f32 %v492_v35, %v396_v7  ;;  %v2759_v7 = vld [vmem:[#allocation27_spill] sm:$0xff] }
 0x184   :  { %v2223_v2 = vadd.f32 %v556_v5, %v2104_v15  ;;  %v1227_v15 = vsel %vm1225_vm3, %v1211_v3, 0.0  ;;  %v1217_v56 = vand.u32 2147483647, %v2759_v7  ;;  %v2761_v3 = vld [vmem:[#allocation29_spill] sm:$0xff] }
 0x185   :  { %2750 = vst [vmem:[#allocation38_spill] sm:$0xff] %v2220_v46 }
 0x188   :  { %703 = vrot.lane.b32.xlu1 %v250_v31, %s1635_s7  ;;  %701 = vrot.lane.b32.xlu0 %v249_v0, %s1635_s7  ;;  %v1215_v31 = vand.u32 2147483647, %v2757_v11  ;;  %v1229_v0 = vsel %vm1225_vm3, %v1213_v4, 0.0 }
 0x189   :  { %699 = vrot.lane.b32.xlu2 %v248_v51, %s1635_s7  ;;  %v2753_v51 = vld [vmem:[#allocation22_spill] sm:$0xff] }
 0x18a   :  { %v548_v14 = vpop.permute.xlu1 %547  ;;  %v546_v26 = vpop.permute.xlu0 %545  ;;  %v1212_v58 = vand.u32 2147483647, %v2753_v51 }
 0x18b   :  { %v616_v38 = vadd.f32 %v548_v14, %v2113_v10  ;;  %v662_v25 = vpop.permute.xlu2 %661  ;;  %v615_v47 = vadd.f32 %v546_v26, %v2116_v28  ;;  %v1226_v28 = vsel %vm1225_vm3, %v1209_v63, 0.0  ;;  %v1218_v63 = vand.u32 2147483647, %v2761_v3 }
 0x18c   :  { %v733_v17 = vadd.f32 %v662_v25, %v613_v13  ;;  %v1228_v8 = vadd.f32 %v1227_v15, %v1226_v28  ;;  %v1242_v9 = vsel %vm1225_vm3, %v1212_v58, 0.0  ;;  %v2762_v58 = vld [vmem:[#allocation32_spill] sm:$0xff] }
 0x18d   :  { %v1243_v12 = vadd.f32 %v1242_v9, %v1241_v29  ;;  %v1221_v60 = vand.u32 2147483647, %v2762_v58 }
 0x18e   :  { %v1230_v20 = vadd.f32 %v1229_v0, %v1228_v8  ;;  %v773_v0 = vmul.f32 0.23388076, %v733_v17 }
 0x18f   :  { %v1245_v26 = vadd.f32 %v1244_v16, %v1243_v12  ;;  %v2275_v9 = vsel %vm1225_vm3, %v1221_v60, 0.0  ;;  %v894_v16 = vmul.f32 0.2920817, %v733_v17 }
 0x190   :  { %707 = vrot.lane.b32.xlu0 %v252_v59, %s1635_s7  ;;  %v1231_v59 = vsel %vm1225_vm3, %v1215_v31, 0.0  ;;  %2765 = vst [vmem:[#allocation19_spill] sm:$0xff] %v2275_v9  ;;  %v822_v60 = vrot.slane %v773_v0, 1 }
 0x191   :  { %705 = vrot.lane.b32.xlu2 %v251_v52, %s1635_s7 }
 0x192   :  { %v554_v10 = vpop.permute.xlu1 %553  ;;  %v552_v54 = vpop.permute.xlu0 %551 }
 0x193   :  { %v2240_v6 = vadd.f32 %v554_v10, %v2128_v57  ;;  %v668_v33 = vpop.permute.xlu2 %667  ;;  %v2243_v53 = vadd.f32 %v552_v54, %v2131_v18  ;;  %v2758_v57 = vld [vmem:[#allocation25_spill] sm:$0xff]  ;;  %v1232_v10 = vadd.f32 %v1231_v59, %v1230_v20  ;;  %v2763_v54 = vld [vmem:[#allocation31_spill] sm:$0xff] }
 0x194   :  { %v736_v52 = vadd.f32 %v668_v33, %v616_v38  ;;  %v1216_v23 = vand.u32 2147483647, %v2758_v57  ;;  %v2760_v38 = vld [vmem:[#allocation28_spill] sm:$0xff]  ;;  %v1222_v28 = vand.u32 2147483647, %v2763_v54 }
 0x195   :  { %v1219_v25 = vand.u32 2147483647, %v2760_v38 }
 0x196   :  { %v1246_v15 = vsel %vm1225_vm3, %v1216_v23, 0.0  ;;  %v757_v23 = vmul.f32 0.120078385, %v733_v17 }
 0x197   :  { %v1247_v4 = vadd.f32 %v1246_v15, %v1245_v26 }
 0x19a   :  { %v560_v18 = vpop.permute.xlu1 %559  ;;  %v558_v40 = vpop.permute.xlu0 %557 }
 0x19b   :  { %v2255_v35 = vadd.f32 %v560_v18, %v2142_v32  ;;  %v562_v13 = vpop.permute.xlu2 %561  ;;  %v2258_v5 = vadd.f32 %v558_v40, %v2145_v36  ;;  %v1233_v32 = vsel %vm1225_vm3, %v1217_v56, 0.0  ;;  %v2270_v36 = vsel %vm1225_vm3, %v1219_v25, 0.0 }
 0x19c   :  { %v2261_v14 = vadd.f32 %v562_v13, %v2118_v22  ;;  %v1248_v22 = vsel %vm1225_vm3, %v1218_v63, 0.0  ;;  %v2277_v29 = vadd.f32 %v1233_v32, %v1232_v10  ;;  %v2282_v56 = vsel %vm1225_vm3, %v1222_v28, 0.0  ;;  %v2768_v13 = vld [vmem:[#allocation33_spill] sm:$0xff] }
 0x19d   :  { %2767 = vst [vmem:[#allocation20_spill] sm:$0xff] %v2282_v56  ;;  %v2285_v25 = vmul.f32 0.23388076, %v736_v52  ;;  %v2287_v10 = vmul.f32 0.2920817, %v736_v52  ;;  %v1016_v32 = vrot.slane %v773_v0, 3  ;;  %v2293_v31 = vadd.f32 %v1248_v22, %v1247_v4 }
 0x19f   :  { %v827_v28 = vrot.slane %v2285_v25, 1  ;;  %v948_v54 = vrot.slane %v2287_v10, 2 }
 0x1a2   :  { %v666_v12 = vpop.permute.xlu1 %665  ;;  %v664_v20 = vpop.permute.xlu0 %663 }
 0x1a3   :  { %v735_v18 = vadd.f32 %v666_v12, %v615_v47  ;;  %v676_v40 = vpop.permute.xlu2 %675  ;;  %v734_v59 = vadd.f32 %v664_v20, %v2195_v49  ;;  %v943_v47 = vrot.slane %v894_v16, 2  ;;  %v1121_v49 = vrot.slane %v757_v23, 4 }
 0x1a4   :  { %v2289_v12 = vmul.f32 0.120078385, %v736_v52  ;;  %v740_v26 = vadd.f32 %v676_v40, %v2223_v2 }
 0x1a5   :  { %v775_v63 = vmul.f32 0.23388076, %v735_v18  ;;  %v896_v15 = vmul.f32 0.2920817, %v735_v18  ;;  %v1088_v17 = vmul.f32 0.120078385, %v735_v18 }
 0x1a6   :  { %v758_v56 = vmul.f32 0.120078385, %v734_v59  ;;  %v774_v9 = vmul.f32 0.23388076, %v734_v59  ;;  %v895_v33 = vmul.f32 0.2920817, %v734_v59 }
 0x1a7   :  { %v825_v20 = vrot.slane %v775_v63, 1  ;;  %v946_v8 = vrot.slane %v896_v15, 2  ;;  %v1021_v18 = vrot.slane %v2285_v25, 3  ;;  %v1019_v16 = vrot.slane %v775_v63, 3 }
 0x1a8   :  { %v1124_v0 = vrot.slane %v1088_v17, 4  ;;  %v823_v46 = vrot.slane %v774_v9, 1  ;;  %v944_v38 = vrot.slane %v895_v33, 2  ;;  %v1017_v3 = vrot.slane %v774_v9, 3 }
 0x1a9   :  { %v1122_v34 = vrot.slane %v758_v56, 4  ;;  %v1126_v2 = vrot.slane %v2289_v12, 4  ;;  %v2300_v4 = vmul.f32 0.120078385, %v740_v26 }
 0x1aa   :  { %v672_v58 = vpop.permute.xlu1 %671  ;;  %v670_v52 = vpop.permute.xlu0 %669  ;;  %v824_v59 = vsel %vm821_vm4, %v822_v60, %v823_v46  ;;  %v826_v25 = vsel %vm821_vm4, %v823_v46, %v825_v20  ;;  %v945_v63 = vsel %vm942_vm5, %v943_v47, %v944_v38  ;;  %v947_v33 = vsel %vm942_vm5, %v944_v38, %v946_v8 }
 0x1ab   :  { %v2297_v15 = vpop.permute.xlu2 %567  ;;  %v738_v22 = vadd.f32 %v672_v58, %v2243_v53  ;;  %v737_v40 = vadd.f32 %v670_v52, %v2210_v55  ;;  %v878_v9 = vadd.f32 %v824_v59, %v757_v23  ;;  %v879_v10 = vadd.f32 %v826_v25, %v758_v56 }
 0x1ac   :  { %v1018_v17 = vsel %vm1015_vm6, %v1016_v32, %v1017_v3  ;;  %v1020_v27 = vsel %vm1015_vm6, %v1017_v3, %v1019_v16  ;;  %v1123_v7 = vsel %vm1120_vm7, %v1121_v49, %v1122_v34  ;;  %v1125_v53 = vsel %vm1120_vm7, %v1122_v34, %v1124_v0 }
 0x1ad   :  { %v778_v58 = vmul.f32 0.23388076, %v738_v22  ;;  %v899_v55 = vmul.f32 0.2920817, %v738_v22  ;;  %v999_v52 = vadd.f32 %v945_v63, %v878_v9  ;;  %v1000_v60 = vadd.f32 %v947_v33, %v879_v10 }
 0x1ae   :  { %v1089_v24 = vmul.f32 0.120078385, %v738_v22  ;;  %v760_v46 = vmul.f32 0.120078385, %v737_v40  ;;  %v2312_v20 = vmul.f32 0.23388076, %v740_v26 }
 0x1af   :  { %v830_v47 = vrot.slane %v778_v58, 1  ;;  %v1024_v38 = vrot.slane %v778_v58, 3  ;;  %v777_v8 = vmul.f32 0.23388076, %v737_v40  ;;  %v2314_v23 = vmul.f32 0.2920817, %v740_v26 }
 0x1b0   :  { %v1072_v56 = vadd.f32 %v1018_v17, %v999_v52  ;;  %v1073_v32 = vadd.f32 %v1020_v27, %v1000_v60  ;;  %v898_v3 = vmul.f32 0.2920817, %v737_v40  ;;  %v951_v34 = vrot.slane %v899_v55, 2 }
 0x1b1   :  { %v1129_v0 = vrot.slane %v1089_v24, 4  ;;  %v828_v59 = vrot.slane %v777_v8, 1  ;;  %v1022_v25 = vrot.slane %v777_v8, 3  ;;  %v1127_v10 = vrot.slane %v760_v46, 4 }
 0x1b2   :  { %v674_v16 = vpop.permute.xlu1 %673  ;;  %v2316_v49 = vpop.permute.xlu0 %563  ;;  %v1177_v22 = vadd.f32 %v1123_v7, %v1072_v56  ;;  %v1178_v33 = vadd.f32 %v1125_v53, %v1073_v32  ;;  %v949_v9 = vrot.slane %v898_v3, 2  ;;  %v833_v40 = vrot.slane %v2312_v20, 1 }
 0x1b3   :  { %v682_v63 = vpop.permute.xlu2 %681  ;;  %v829_v58 = vsel %vm821_vm4, %v827_v28, %v828_v59  ;;  %v831_v26 = vsel %vm821_vm4, %v828_v59, %v830_v47  ;;  %v1023_v17 = vsel %vm1015_vm6, %v1021_v18, %v1022_v25  ;;  %v1025_v27 = vsel %vm1015_vm6, %v1022_v25, %v1024_v38 }
 0x1b4   :  { %v954_v55 = vrot.slane %v2314_v23, 2  ;;  %v1269_v24 = vand.u32 2147483647, %v1177_v22  ;;  %v739_v52 = vadd.f32 %v674_v16, %v2240_v6  ;;  %v880_v7 = vadd.f32 %v829_v58, %v2289_v12 }
 0x1b5   :  { %v881_v53 = vadd.f32 %v831_v26, %v760_v46  ;;  %v950_v60 = vsel %vm942_vm5, %v948_v54, %v949_v9  ;;  %v952_v28 = vsel %vm942_vm5, %v949_v9, %v951_v34  ;;  %v1027_v47 = vrot.slane %v2312_v20, 3 }
 0x1b6   :  { %v1132_v18 = vrot.slane %v2300_v4, 4  ;;  %v1193_v38 = vsub.f32 %v2752_v43, %v1177_v22  ;;  %v1270_v8 = vand.u32 2147483647, %v1178_v33  ;;  %v1001_v56 = vadd.f32 %v950_v60, %v880_v7 }
 0x1b7   :  { %v1002_v32 = vadd.f32 %v952_v28, %v881_v53  ;;  %v1128_v3 = vsel %vm1120_vm7, %v1126_v2, %v1127_v10  ;;  %v1130_v6 = vsel %vm1120_vm7, %v1127_v10, %v1129_v0  ;;  %v1194_v12 = vsub.f32 %v2754_v1, %v1178_v33 }
 0x1b8   :  { %v761_v46 = vmul.f32 0.120078385, %v739_v52  ;;  %v779_v16 = vmul.f32 0.23388076, %v739_v52  ;;  %v743_v54 = vadd.f32 %v682_v63, %v2261_v14  ;;  %v1285_v25 = vsel %vm1225_vm3, %v1269_v24, 0.0 }
 0x1b9   :  { %v1074_v9 = vadd.f32 %v1023_v17, %v1001_v56  ;;  %v1075_v43 = vadd.f32 %v1025_v27, %v1002_v32  ;;  %v900_v22 = vmul.f32 0.2920817, %v739_v52  ;;  %v1328_v26 = vand.u32 2147483647, %v1193_v38 }
 0x1ba   :  { %v2335_v34 = vpop.permute.xlu1 %565  ;;  %v678_v59 = vpop.permute.xlu0 %677  ;;  %v832_v2 = vrot.slane %v779_v16, 1  ;;  %v1026_v7 = vrot.slane %v779_v16, 3  ;;  %v1131_v0 = vrot.slane %v761_v46, 4  ;;  %v1300_v1 = vsel %vm1225_vm3, %v1270_v8, 0.0 }
 0x1bb   :  { %v2338_v58 = vpop.permute.xlu2 %573  ;;  %v1179_v33 = vadd.f32 %v1128_v3, %v1074_v9  ;;  %v1180_v10 = vadd.f32 %v1130_v6, %v1075_v43  ;;  %v953_v53 = vrot.slane %v900_v22, 2  ;;  %v1329_v14 = vand.u32 2147483647, %v1194_v12 }
 0x1bc   :  { %v834_v63 = vsel %vm821_vm4, %v832_v2, %v833_v40  ;;  %v1028_v17 = vsel %vm1015_vm6, %v1026_v7, %v1027_v47  ;;  %v1133_v27 = vsel %vm1120_vm7, %v1131_v0, %v1132_v18  ;;  %v1344_v38 = vsel %vm1225_vm3, %v1328_v26, 0.0 }
 0x1bd   :  { %v1195_v24 = vsub.f32 %v2751_v44, %v1179_v33  ;;  %v1196_v52 = vsub.f32 %v2753_v51, %v1180_v10  ;;  %v1271_v60 = vand.u32 2147483647, %v1179_v33  ;;  %v1272_v28 = vand.u32 2147483647, %v1180_v10 }
 0x1be   :  { %v882_v8 = vadd.f32 %v834_v63, %v761_v46  ;;  %v955_v56 = vsel %vm942_vm5, %v953_v53, %v954_v55  ;;  %v2356_v32 = vmul.f32 0.23388076, %v743_v54  ;;  %v2362_v43 = vmul.f32 0.2920817, %v743_v54 }
 0x1bf   :  { %v1286_v3 = vsel %vm1225_vm3, %v1271_v60, 0.0  ;;  %v1301_v6 = vsel %vm1225_vm3, %v1272_v28, 0.0  ;;  %v1330_v12 = vand.u32 2147483647, %v1195_v24  ;;  %v1331_v16 = vand.u32 2147483647, %v1196_v52 }
 0x1c0   :  { %v1287_v44 = vadd.f32 %v1286_v3, %v1285_v25  ;;  %v2360_v9 = vadd.f32 %v1301_v6, %v1300_v1  ;;  %v1003_v51 = vadd.f32 %v955_v56, %v882_v8  ;;  %v1359_v26 = vsel %vm1225_vm3, %v1329_v14, 0.0 }
 0x1c1   :  { %v1345_v2 = vsel %vm1225_vm3, %v1330_v12, 0.0  ;;  %v1360_v7 = vsel %vm1225_vm3, %v1331_v16, 0.0  ;;  %v2371_v0 = vadd.f32 %v2316_v49, %v2161_v45  ;;  %v2769_v25 = vand.u32 2147483647, %v2766_v37 }
 0x1c2   :  { %v680_v22 = vpop.permute.xlu1 %679  ;;  %v2364_v46 = vpop.permute.xlu0 %569  ;;  %v1346_v10 = vadd.f32 %v1345_v2, %v1344_v38  ;;  %v2376_v53 = vadd.f32 %v1360_v7, %v1359_v26  ;;  %v1076_v63 = vadd.f32 %v1028_v17, %v1003_v51  ;;  %v626_v14 = vadd.f32 %v2297_v15, %v2133_v42 }
 0x1c3   :  { %v688_v33 = vpop.permute.xlu2 %687  ;;  %v1250_v1 = vsel %vm1225_vm3, %v2769_v25, 0.0  ;;  %v2380_v24 = vmul.f32 0.120078385, %v743_v54  ;;  %v741_v52 = vadd.f32 %v678_v59, %v2258_v5  ;;  %v742_v60 = vadd.f32 %v680_v22, %v2255_v35 }
 0x1c4   :  { %v1181_v45 = vadd.f32 %v1133_v27, %v1076_v63  ;;  %v838_v49 = vrot.slane %v2356_v32, 1  ;;  %v959_v28 = vrot.slane %v2362_v43, 2  ;;  %v1032_v8 = vrot.slane %v2356_v32, 3 }
 0x1c5   :  { %v781_v38 = vmul.f32 0.23388076, %v741_v52  ;;  %v902_v56 = vmul.f32 0.2920817, %v741_v52  ;;  %v1090_v3 = vmul.f32 0.120078385, %v741_v52  ;;  %v746_v17 = vadd.f32 %v688_v33, %v626_v14 }
 0x1c6   :  { %v1197_v6 = vsub.f32 %v2755_v19, %v1181_v45  ;;  %v1273_v42 = vand.u32 2147483647, %v1181_v45  ;;  %v763_v15 = vmul.f32 0.120078385, %v742_v60  ;;  %v782_v54 = vmul.f32 0.23388076, %v742_v60 }
 0x1c7   :  { %v835_v12 = vrot.slane %v781_v38, 1  ;;  %v956_v5 = vrot.slane %v902_v56, 2  ;;  %v1029_v59 = vrot.slane %v781_v38, 3  ;;  %v1134_v35 = vrot.slane %v1090_v3, 4 }
 0x1c8   :  { %v1288_v27 = vsel %vm1225_vm3, %v1273_v42, 0.0  ;;  %v1332_v16 = vand.u32 2147483647, %v1197_v6  ;;  %v837_v51 = vrot.slane %v782_v54, 1  ;;  %v903_v22 = vmul.f32 0.2920817, %v742_v60 }
 0x1c9   :  { %v1289_v7 = vadd.f32 %v1288_v27, %v1287_v44  ;;  %v836_v19 = vsel %vm821_vm4, %v833_v40, %v835_v12  ;;  %v957_v33 = vsel %vm942_vm5, %v954_v55, %v956_v5  ;;  %v1030_v25 = vsel %vm1015_vm6, %v1027_v47, %v1029_v59 }
 0x1ca   :  { %v2389_v26 = vpop.permute.xlu1 %571  ;;  %v684_v2 = vpop.permute.xlu0 %683  ;;  %v1347_v14 = vsel %vm1225_vm3, %v1332_v16, 0.0  ;;  %v883_v52 = vadd.f32 %v836_v19, %v2300_v4  ;;  %v1135_v44 = vsel %vm1120_vm7, %v1132_v18, %v1134_v35  ;;  %v839_v23 = vsel %vm821_vm4, %v837_v51, %v838_v49 }
 0x1cb   :  { %v2400_v63 = vpop.permute.xlu2 %579  ;;  %v1348_v40 = vadd.f32 %v1347_v14, %v1346_v10  ;;  %v884_v55 = vadd.f32 %v839_v23, %v763_v15  ;;  %v958_v60 = vrot.slane %v903_v22, 2  ;;  %v1031_v20 = vrot.slane %v782_v54, 3 }
 0x1cc   :  { %v1137_v47 = vrot.slane %v2380_v24, 4  ;;  %v1004_v45 = vadd.f32 %v957_v33, %v883_v52  ;;  %v1136_v38 = vrot.slane %v763_v15, 4  ;;  %v2411_v56 = vmul.f32 0.23388076, %v746_v17 }
 0x1cd   :  { %v960_v4 = vsel %vm942_vm5, %v958_v60, %v959_v28  ;;  %v1033_v18 = vsel %vm1015_vm6, %v1031_v20, %v1032_v8  ;;  %v2419_v3 = vmul.f32 0.120078385, %v746_v17  ;;  %v2421_v10 = vmul.f32 0.2920817, %v746_v17 }
 0x1ce   :  { %v2425_v6 = vadd.f32 %v2270_v36, %v2277_v29  ;;  %v1077_v42 = vadd.f32 %v1030_v25, %v1004_v45  ;;  %v1005_v15 = vadd.f32 %v960_v4, %v884_v55  ;;  %v1138_v54 = vsel %vm1120_vm7, %v1136_v38, %v1137_v47 }
 0x1cf   :  { %v2429_v12 = vadd.f32 %v1250_v1, %v2293_v31  ;;  %v2770_v5 = vand.u32 2147483647, %v2768_v13  ;;  %v625_v17 = vadd.f32 %v2335_v34, %v2158_v62  ;;  %v629_v35 = vadd.f32 %v2338_v58, %v2147_v41 }
 0x1d0   :  { %v1182_v36 = vadd.f32 %v1135_v44, %v1077_v42  ;;  %v1078_v29 = vadd.f32 %v1033_v18, %v1005_v15  ;;  %v843_v27 = vrot.slane %v2411_v56, 1  ;;  %v744_v16 = vadd.f32 %v684_v2, %v2371_v0 }
 0x1d1   :  { %v2434_v59 = vsel %vm1225_vm3, %v2770_v5, 0.0  ;;  %v964_v1 = vrot.slane %v2421_v10, 2  ;;  %v1037_v22 = vrot.slane %v2411_v56, 3  ;;  %v1142_v19 = vrot.slane %v2419_v3, 4 }
 0x1d2   :  { %v686_v51 = vpop.permute.xlu1 %685  ;;  %v576_v31 = vpop.permute.xlu0 %575  ;;  %v1198_v62 = vsub.f32 %v2756_v30, %v1182_v36  ;;  %v1274_v34 = vand.u32 2147483647, %v1182_v36  ;;  %v1183_v41 = vadd.f32 %v1138_v54, %v1078_v29  ;;  %v784_v58 = vmul.f32 0.23388076, %v744_v16 }
 0x1d3   :  { %v745_v33 = vadd.f32 %v686_v51, %v625_v17  ;;  %v694_v25 = vpop.permute.xlu2 %693  ;;  %v905_v14 = vmul.f32 0.2920817, %v744_v16  ;;  %v1091_v52 = vmul.f32 0.120078385, %v744_v16 }
 0x1d4   :  { %v749_v23 = vadd.f32 %v694_v25, %v629_v35  ;;  %v1303_v0 = vsel %vm1225_vm3, %v1274_v34, 0.0  ;;  %v1333_v2 = vand.u32 2147483647, %v1198_v62  ;;  %v1199_v55 = vsub.f32 %v2757_v11, %v1183_v41 }
 0x1d5   :  { %v765_v44 = vmul.f32 0.120078385, %v745_v33  ;;  %v1275_v60 = vand.u32 2147483647, %v1183_v41  ;;  %v1304_v20 = vadd.f32 %v1303_v0, %v2360_v9  ;;  %v840_v45 = vrot.slane %v784_v58, 1 }
 0x1d6   :  { %v961_v38 = vrot.slane %v905_v14, 2  ;;  %v1034_v4 = vrot.slane %v784_v58, 3  ;;  %v1362_v30 = vsel %vm1225_vm3, %v1333_v2, 0.0  ;;  %v1334_v42 = vand.u32 2147483647, %v1199_v55 }
 0x1d7   :  { %v1290_v18 = vsel %vm1225_vm3, %v1275_v60, 0.0  ;;  %v1139_v15 = vrot.slane %v1091_v52, 4  ;;  %v1363_v54 = vadd.f32 %v1362_v30, %v2376_v53  ;;  %v841_v11 = vsel %vm821_vm4, %v838_v49, %v840_v45 }
 0x1d8   :  { %v2452_v5 = vadd.f32 %v1290_v18, %v1289_v7  ;;  %v962_v9 = vsel %vm942_vm5, %v959_v28, %v961_v38  ;;  %v1349_v17 = vsel %vm1225_vm3, %v1334_v42, 0.0  ;;  %v885_v35 = vadd.f32 %v841_v11, %v2380_v24 }
 0x1d9   :  { %v1035_v36 = vsel %vm1015_vm6, %v1032_v8, %v1034_v4  ;;  %v1140_v53 = vsel %vm1120_vm7, %v1137_v47, %v1139_v15  ;;  %v2466_v16 = vadd.f32 %v1349_v17, %v1348_v40  ;;  %v785_v51 = vmul.f32 0.23388076, %v745_v33 }
 0x1da   :  { %v578_v7 = vpop.permute.xlu1 %577  ;;  %v690_v29 = vpop.permute.xlu0 %689  ;;  %v906_v49 = vmul.f32 0.2920817, %v745_v33  ;;  %v1141_v25 = vrot.slane %v765_v44, 4  ;;  %v1006_v62 = vadd.f32 %v962_v9, %v885_v35  ;;  %v2468_v28 = vmul.f32 0.120078385, %v749_v23 }
 0x1db   :  { %v586_v43 = vpop.permute.xlu2 %585  ;;  %v2470_v34 = vmul.f32 0.23388076, %v749_v23  ;;  %v2472_v24 = vmul.f32 0.2920817, %v749_v23  ;;  %v842_v32 = vrot.slane %v785_v51, 1  ;;  %v1036_v8 = vrot.slane %v785_v51, 3 }
 0x1dc   :  { %v963_v41 = vrot.slane %v906_v49, 2  ;;  %v1143_v47 = vsel %vm1120_vm7, %v1141_v25, %v1142_v19  ;;  %v627_v40 = vadd.f32 %v2364_v46, %v2177_v39  ;;  %v628_v33 = vadd.f32 %v2389_v26, %v2174_v21 }
 0x1dd   :  { %v632_v58 = vadd.f32 %v2400_v63, %v2163_v61  ;;  %v1079_v14 = vadd.f32 %v1035_v36, %v1006_v62  ;;  %v844_v52 = vsel %vm821_vm4, %v842_v32, %v843_v27  ;;  %v1038_v0 = vsel %vm1015_vm6, %v1036_v8, %v1037_v22  ;;  %v2772_v8 = vld [vmem:[#allocation27_spill] sm:$0xff] }
 0x1de   :  { %v965_v23 = vsel %vm942_vm5, %v963_v41, %v964_v1  ;;  %v2493_v39 = vadd.f32 %v576_v31, %v2192_v50  ;;  %v886_v46 = vadd.f32 %v844_v52, %v765_v44  ;;  %v848_v61 = vrot.slane %v2470_v34, 1  ;;  %v2771_v50 = vld [vmem:[#allocation35_spill] sm:$0xff]  ;;  %v2773_v52 = vld [vmem:[#allocation37_spill] sm:$0xff] }
 0x1df   :  { %v1184_v21 = vadd.f32 %v1140_v53, %v1079_v14  ;;  %v969_v26 = vrot.slane %v2472_v24, 2  ;;  %v1042_v63 = vrot.slane %v2470_v34, 3  ;;  %v1147_v2 = vrot.slane %v2468_v28, 4 }
 0x1e0   :  { %v2500_v55 = vadd.f32 %v578_v7, %v2190_v48  ;;  %v747_v60 = vadd.f32 %v690_v29, %v627_v40  ;;  %v1007_v4 = vadd.f32 %v965_v23, %v886_v46  ;;  %v635_v31 = vadd.f32 %v586_v43, %v2771_v50 }
 0x1e1   :  { %v1200_v45 = vsub.f32 %v2758_v57, %v1184_v21  ;;  %v1276_v38 = vand.u32 2147483647, %v1184_v21 }
 0x1e2   :  { %v692_v30 = vpop.permute.xlu1 %691  ;;  %v582_v44 = vpop.permute.xlu0 %581  ;;  %v787_v18 = vmul.f32 0.23388076, %v747_v60  ;;  %v908_v42 = vmul.f32 0.2920817, %v747_v60  ;;  %v1092_v15 = vmul.f32 0.120078385, %v747_v60  ;;  %v1080_v36 = vadd.f32 %v1038_v0, %v1007_v4 }
 0x1e3   :  { %v748_v11 = vadd.f32 %v692_v30, %v628_v33  ;;  %v700_v9 = vpop.permute.xlu2 %699  ;;  %v1305_v17 = vsel %vm1225_vm3, %v1276_v38, 0.0  ;;  %v1335_v35 = vand.u32 2147483647, %v1200_v45  ;;  %v2521_v10 = vadd.f32 %v582_v44, %v2773_v52 }
 0x1e4   :  { %v752_v48 = vadd.f32 %v700_v9, %v632_v58  ;;  %v1306_v53 = vadd.f32 %v1305_v17, %v1304_v20  ;;  %v845_v7 = vrot.slane %v787_v18, 1  ;;  %v966_v29 = vrot.slane %v908_v42, 2 }
 0x1e5   :  { %v1039_v57 = vrot.slane %v787_v18, 3  ;;  %v1364_v51 = vsel %vm1225_vm3, %v1335_v35, 0.0  ;;  %v1185_v49 = vadd.f32 %v1143_v47, %v1080_v36  ;;  %v1144_v25 = vrot.slane %v1092_v15, 4 }
 0x1e6   :  { %v767_v43 = vmul.f32 0.120078385, %v748_v11  ;;  %v1365_v62 = vadd.f32 %v1364_v51, %v1363_v54  ;;  %v846_v32 = vsel %vm821_vm4, %v843_v27, %v845_v7  ;;  %v967_v41 = vsel %vm942_vm5, %v964_v1, %v966_v29  ;;  %v2775_v51 = vld [vmem:[#allocation29_spill] sm:$0xff] }
 0x1e7   :  { %v1040_v20 = vsel %vm1015_vm6, %v1037_v22, %v1039_v57  ;;  %v1201_v40 = vsub.f32 %v2772_v8, %v1185_v49  ;;  %v1277_v33 = vand.u32 2147483647, %v1185_v49  ;;  %v887_v47 = vadd.f32 %v846_v32, %v2419_v3 }
 0x1e8   :  { %v1145_v54 = vsel %vm1120_vm7, %v1142_v19, %v1144_v25  ;;  %v788_v58 = vmul.f32 0.23388076, %v748_v11  ;;  %v909_v14 = vmul.f32 0.2920817, %v748_v11  ;;  %v1146_v27 = vrot.slane %v767_v43, 4 }
 0x1e9   :  { %v1292_v1 = vsel %vm1225_vm3, %v1277_v33, 0.0  ;;  %v1336_v56 = vand.u32 2147483647, %v1201_v40  ;;  %v1008_v23 = vadd.f32 %v967_v41, %v887_v47  ;;  %v2524_v22 = vmul.f32 0.120078385, %v752_v48 }
 0x1ea   :  { %v584_v0 = vpop.permute.xlu1 %583  ;;  %v696_v21 = vpop.permute.xlu0 %695  ;;  %v847_v46 = vrot.slane %v788_v58, 1  ;;  %v968_v60 = vrot.slane %v909_v14, 2  ;;  %v1041_v45 = vrot.slane %v788_v58, 3  ;;  %v1148_v3 = vsel %vm1120_vm7, %v1146_v27, %v1147_v2 }
 0x1eb   :  { %v1351_v19 = vsel %vm1225_vm3, %v1336_v56, 0.0  ;;  %v1081_v38 = vadd.f32 %v1040_v20, %v1008_v23  ;;  %v2530_v4 = vmul.f32 0.23388076, %v752_v48  ;;  %v2532_v50 = vmul.f32 0.2920817, %v752_v48  ;;  %v706_v30 = vpop.permute.xlu2 %705  ;;  %v2774_v48 = vld [vmem:[#allocation36_spill] sm:$0xff] }
 0x1ec   :  { %v849_v44 = vsel %vm821_vm4, %v847_v46, %v848_v61  ;;  %v970_v18 = vsel %vm942_vm5, %v968_v60, %v969_v26  ;;  %v1043_v42 = vsel %vm1015_vm6, %v1041_v45, %v1042_v63  ;;  %v1152_v15 = vrot.slane %v2524_v22, 4  ;;  %v2776_v45 = vld [vmem:[#allocation28_spill] sm:$0xff] }
 0x1ed   :  { %v1186_v11 = vadd.f32 %v1145_v54, %v1081_v38  ;;  %v888_v9 = vadd.f32 %v849_v44, %v767_v43  ;;  %v853_v17 = vrot.slane %v2530_v4, 1  ;;  %v974_v35 = vrot.slane %v2532_v50, 2 }
 0x1ee   :  { %v1047_v36 = vrot.slane %v2530_v4, 3  ;;  %v634_v7 = vadd.f32 %v584_v0, %v2774_v48  ;;  %v755_v29 = vadd.f32 %v706_v30, %v635_v31  ;;  %v750_v57 = vadd.f32 %v696_v21, %v2493_v39  ;;  %v2777_v48 = vld [vmem:[#allocation38_spill] sm:$0xff] }
 0x1ef   :  { %v1202_v49 = vsub.f32 %v2775_v51, %v1186_v11  ;;  %v1278_v25 = vand.u32 2147483647, %v1186_v11  ;;  %v1009_v32 = vadd.f32 %v970_v18, %v888_v9  ;;  %v1293_v41 = vadd.f32 %v1292_v1, %v2452_v5 }
 0x1f0   :  { %v2551_v20 = vmul.f32 0.120078385, %v755_v29  ;;  %v2553_v43 = vmul.f32 0.23388076, %v755_v29  ;;  %v2555_v8 = vmul.f32 0.2920817, %v755_v29  ;;  %v2558_v40 = vadd.f32 %v1351_v19, %v2466_v16 }
 0x1f1   :  { %v1307_v33 = vsel %vm1225_vm3, %v1278_v25, 0.0  ;;  %v1337_v31 = vand.u32 2147483647, %v1202_v49  ;;  %v1082_v47 = vadd.f32 %v1043_v42, %v1009_v32  ;;  %v790_v39 = vmul.f32 0.23388076, %v750_v57 }
 0x1f2   :  { %v698_v54 = vpop.permute.xlu1 %697  ;;  %v588_v58 = vpop.permute.xlu0 %587  ;;  %v2561_v14 = vadd.f32 %v1307_v33, %v1306_v53  ;;  %v858_v5 = vrot.slane %v2553_v43, 1  ;;  %v979_v27 = vrot.slane %v2555_v8, 2  ;;  %v1052_v52 = vrot.slane %v2553_v43, 3 }
 0x1f3   :  { %v1366_v1 = vsel %vm1225_vm3, %v1337_v31, 0.0  ;;  %v1187_v56 = vadd.f32 %v1148_v3, %v1082_v47  ;;  %v1157_v16 = vrot.slane %v2551_v20, 4  ;;  %v850_v23 = vrot.slane %v790_v39, 1 }
 0x1f4   :  { %v2568_v0 = vadd.f32 %v1366_v1, %v1365_v62  ;;  %v911_v21 = vmul.f32 0.2920817, %v750_v57  ;;  %v1044_v46 = vrot.slane %v790_v39, 3  ;;  %v1093_v60 = vmul.f32 0.120078385, %v750_v57 }
 0x1f5   :  { %v1203_v53 = vsub.f32 %v2776_v45, %v1187_v56  ;;  %v1279_v19 = vand.u32 2147483647, %v1187_v56  ;;  %v851_v38 = vsel %vm821_vm4, %v848_v61, %v850_v23  ;;  %v751_v30 = vadd.f32 %v698_v54, %v2500_v55 }
 0x1f6   :  { %v889_v44 = vadd.f32 %v851_v38, %v2468_v28  ;;  %v971_v3 = vrot.slane %v911_v21, 2  ;;  %v1045_v62 = vsel %vm1015_vm6, %v1042_v63, %v1044_v46  ;;  %v1149_v18 = vrot.slane %v1093_v60, 4 }
 0x1f7   :  { %v2579_v42 = vand.u32 2147483647, %v1203_v53  ;;  %v769_v11 = vmul.f32 0.120078385, %v751_v30  ;;  %v791_v9 = vmul.f32 0.23388076, %v751_v30  ;;  %v636_v29 = vadd.f32 %v588_v58, %v2777_v48 }
 0x1f8   :  { %v972_v61 = vsel %vm942_vm5, %v969_v26, %v971_v3  ;;  %v1150_v55 = vsel %vm1120_vm7, %v1147_v2, %v1149_v18  ;;  %v912_v57 = vmul.f32 0.2920817, %v751_v30  ;;  %v1294_v34 = vsel %vm1225_vm3, %v1279_v19, 0.0 }
 0x1f9   :  { %v1010_v51 = vadd.f32 %v972_v61, %v889_v44  ;;  %v852_v63 = vrot.slane %v791_v9, 1  ;;  %v1046_v49 = vrot.slane %v791_v9, 3  ;;  %v1151_v25 = vrot.slane %v769_v11, 4 }
 0x1fa   :  { %v704_v32 = vpop.permute.xlu1 %703  ;;  %v702_v33 = vpop.permute.xlu0 %701  ;;  %v973_v31 = vrot.slane %v912_v57, 2  ;;  %v1295_v24 = vadd.f32 %v1294_v34, %v1293_v41 }
 0x1fb   :  { %v754_v47 = vadd.f32 %v704_v32, %v634_v7  ;;  %v753_v39 = vadd.f32 %v702_v33, %v2521_v10  ;;  %v1083_v54 = vadd.f32 %v1045_v62, %v1010_v51  ;;  %v854_v28 = vsel %vm821_vm4, %v852_v63, %v853_v17 }
 0x1fc   :  { %v1048_v26 = vsel %vm1015_vm6, %v1046_v49, %v1047_v36  ;;  %v1153_v2 = vsel %vm1120_vm7, %v1151_v25, %v1152_v15  ;;  %v890_v58 = vadd.f32 %v854_v28, %v769_v11  ;;  %v975_v7 = vsel %vm942_vm5, %v973_v31, %v974_v35  ;;  %v2778_v31 = vld [vmem:[#allocation32_spill] sm:$0xff] }
 0x1fd   :  { %v771_v10 = vmul.f32 0.120078385, %v754_v47  ;;  %v794_v41 = vmul.f32 0.23388076, %v754_v47  ;;  %v1188_v1 = vadd.f32 %v1150_v55, %v1083_v54  ;;  %v915_v56 = vmul.f32 0.2920817, %v754_v47 }
 0x1fe   :  { %v793_v23 = vmul.f32 0.23388076, %v753_v39  ;;  %v914_v21 = vmul.f32 0.2920817, %v753_v39  ;;  %v1011_v46 = vadd.f32 %v975_v7, %v890_v58  ;;  %v1094_v33 = vmul.f32 0.120078385, %v753_v39 }
 0x1ff   :  { %v857_v60 = vrot.slane %v794_v41, 1  ;;  %v1051_v45 = vrot.slane %v794_v41, 3  ;;  %v1156_v53 = vrot.slane %v771_v10, 4  ;;  %v1204_v19 = vsub.f32 %v2766_v37, %v1188_v1 }
 0x200   :  { %v1280_v38 = vand.u32 2147483647, %v1188_v1  ;;  %v978_v30 = vrot.slane %v915_v56, 2  ;;  %v855_v44 = vrot.slane %v793_v23, 1  ;;  %v1084_v3 = vadd.f32 %v1048_v26, %v1011_v46 }
 0x201   :  { %v859_v62 = vsel %vm821_vm4, %v857_v60, %v858_v5  ;;  %v1053_v18 = vsel %vm1015_vm6, %v1051_v45, %v1052_v52  ;;  %v1158_v11 = vsel %vm1120_vm7, %v1156_v53, %v1157_v16  ;;  %v1339_v48 = vand.u32 2147483647, %v1204_v19 }
 0x202   :  { %v1309_v9 = vsel %vm1225_vm3, %v1280_v38, 0.0  ;;  %v892_v37 = vadd.f32 %v859_v62, %v771_v10  ;;  %v980_v61 = vsel %vm942_vm5, %v978_v30, %v979_v27  ;;  %v1189_v55 = vadd.f32 %v1153_v2, %v1084_v3  ;;  %v708_v63 = vpop.permute.xlu0 %707  ;;  %v2779_v30 = vld [vmem:[#allocation31_spill] sm:$0xff] }
 0x203   :  { %v856_v57 = vsel %vm821_vm4, %v853_v17, %v855_v44  ;;  %v976_v34 = vrot.slane %v914_v21, 2  ;;  %v1049_v51 = vrot.slane %v793_v23, 3  ;;  %v1368_v49 = vsel %vm1225_vm3, %v1339_v48, 0.0 }
 0x204   :  { %v1013_v25 = vadd.f32 %v980_v61, %v892_v37  ;;  %v891_v32 = vadd.f32 %v856_v57, %v2524_v22  ;;  %v1205_v47 = vsub.f32 %v2778_v31, %v1189_v55  ;;  %v1281_v54 = vand.u32 2147483647, %v1189_v55  ;;  %v2780_v61 = vld [vmem:[#allocation34_spill] sm:$0xff]  ;;  %v2782_v55 = vld [vmem:[#allocation19_spill] sm:$0xff] }
 0x205   :  { %v977_v28 = vsel %vm942_vm5, %v974_v35, %v976_v34  ;;  %v1050_v17 = vsel %vm1015_vm6, %v1047_v36, %v1049_v51  ;;  %v1154_v58 = vrot.slane %v1094_v33, 4  ;;  %v756_v7 = vadd.f32 %v708_v63, %v636_v29 }
 0x206   :  { %v1086_v26 = vadd.f32 %v1053_v18, %v1013_v25  ;;  %v1012_v2 = vadd.f32 %v977_v28, %v891_v32  ;;  %v1340_v10 = vand.u32 2147483647, %v1205_v47  ;;  %v1296_v41 = vsel %vm1225_vm3, %v1281_v54, 0.0  ;;  %v2783_v25 = vld [vmem:[#allocation20_spill] sm:$0xff] }
 0x207   :  { %v1310_v39 = vadd.f32 %v1309_v9, %v2561_v14  ;;  %v1353_v1 = vsel %vm1225_vm3, %v2579_v42, 0.0  ;;  %v1155_v4 = vsel %vm1120_vm7, %v1152_v15, %v1154_v58  ;;  %v796_v35 = vmul.f32 0.23388076, %v756_v7 }
 0x208   :  { %v1191_v56 = vadd.f32 %v1158_v11, %v1086_v26  ;;  %v1085_v50 = vadd.f32 %v1050_v17, %v1012_v2  ;;  %v917_v36 = vmul.f32 0.2920817, %v756_v7  ;;  %v1095_v23 = vmul.f32 0.120078385, %v756_v7 }
 0x209   :  { %v1297_v21 = vadd.f32 %v1296_v41, %v1295_v24  ;;  %v1354_v29 = vadd.f32 %v1353_v1, %v2558_v40  ;;  %v860_v45 = vrot.slane %v796_v35, 1  ;;  %v1054_v14 = vrot.slane %v796_v35, 3 }
 0x20a   :  { %v1207_v46 = vsub.f32 %v2768_v13, %v1191_v56  ;;  %v1190_v60 = vadd.f32 %v1155_v4, %v1085_v50  ;;  %v981_v53 = vrot.slane %v917_v36, 2  ;;  %v1159_v19 = vrot.slane %v1095_v23, 4 }
 0x20b   :  { %v1283_v42 = vand.u32 2147483647, %v1191_v56  ;;  %v1355_v38 = vsel %vm1225_vm3, %v1340_v10, 0.0  ;;  %v861_v15 = vsel %vm821_vm4, %v858_v5, %v860_v45  ;;  %v1055_v40 = vsel %vm1015_vm6, %v1052_v52, %v1054_v14 }
 0x20c   :  { %v1206_v22 = vsub.f32 %v2779_v30, %v1190_v60  ;;  %v1282_v44 = vand.u32 2147483647, %v1190_v60  ;;  %v893_v13 = vadd.f32 %v861_v15, %v2551_v20  ;;  %v982_v24 = vsel %vm942_vm5, %v979_v27, %v981_v53 }
 0x20d   :  { %v1160_v3 = vsel %vm1120_vm7, %v1157_v16, %v1159_v19  ;;  %v1298_v62 = vsel %vm1225_vm3, %v1283_v42, 0.0  ;;  %v1342_v9 = vand.u32 2147483647, %v1207_v46  ;;  %v1356_v52 = vadd.f32 %v1355_v38, %v1354_v29 }
 0x20e   :  { %v1341_v18 = vand.u32 2147483647, %v1206_v22  ;;  %v1299_v11 = vadd.f32 %v1298_v62, %v1297_v21  ;;  %v1311_v5 = vsel %vm1225_vm3, %v1282_v44, 0.0  ;;  %v1014_v43 = vadd.f32 %v982_v24, %v893_v13 }
 0x20f   :  { %v1312_v48 = vadd.f32 %v1311_v5, %v1310_v39  ;;  %v1369_v37 = vadd.f32 %v1368_v49, %v2568_v0  ;;  %v2781_v8 = vand.u32 2147483647, %v2780_v61  ;;  %v1357_v20 = vsel %vm1225_vm3, %v1342_v9, 0.0 }
 0x210   :  { %v1370_v16 = vsel %vm1225_vm3, %v1341_v18, 0.0  ;;  %v1238_v57 = vadd.f32 %v2782_v55, %v2425_v6  ;;  %v1087_v34 = vadd.f32 %v1055_v40, %v1014_v43  ;;  %v1358_v51 = vadd.f32 %v1357_v20, %v1356_v52 }
 0x211   :  { %v1254_v27 = vsel %vm1225_vm3, %v2781_v8, 0.0  ;;  %v1371_v63 = vadd.f32 %v1370_v16, %v1369_v37  ;;  %v1253_v32 = vadd.f32 %v2783_v25, %v2429_v12  ;;  %v1315_v12 = vsel %vm1225_vm3, %v1299_v11, 0.0 }
 0x212   :  { %v1240_v33 = vadd.f32 %v2434_v59, %v1238_v57  ;;  %v1192_v0 = vadd.f32 %v1160_v3, %v1087_v34  ;;  %v1374_v1 = vsel %vm1225_vm3, %v1358_v51, 0.0 }
 0x213   :  { %v1255_v49 = vadd.f32 %v1254_v27, %v1253_v32 }
 0x214   :  { %v1256_v31 = vsel %vm1225_vm3, %v1240_v33, 0.0  ;;  %v1208_v47 = vsub.f32 %v2780_v61, %v1192_v0  ;;  %v1284_v54 = vand.u32 2147483647, %v1192_v0 }
 0x215   :  { %v1257_v28 = vsel %vm1225_vm3, %v1255_v49, 0.0 }
 0x216   :  { %v1258_v17 = vadd.f32 %v1257_v28, %v1256_v31  ;;  %v1343_v26 = vand.u32 2147483647, %v1208_v47  ;;  %v1313_v6 = vsel %vm1225_vm3, %v1284_v54, 0.0 }
 0x217   :  { %v1314_v2 = vadd.f32 %v1313_v6, %v1312_v48 }
 0x218   :  { %v1259_v58 = vrot.slane %v1258_v17, 4  ;;  %v1372_v7 = vsel %vm1225_vm3, %v1343_v26, 0.0 }
 0x219   :  { %v1316_v59 = vsel %vm1225_vm3, %v1314_v2, 0.0  ;;  %v1373_v10 = vadd.f32 %v1372_v7, %v1371_v63 }
 0x21a   :  { %v1260_v41 = vadd.f32 %v1259_v58, %v1258_v17  ;;  %v1317_v39 = vadd.f32 %v1316_v59, %v1315_v12 }
 0x21b   :  { %v1375_v56 = vsel %vm1225_vm3, %v1373_v10, 0.0 }
 0x21c   :  { %v1261_v50 = vrot.slane %v1260_v41, 2  ;;  %v1318_v4 = vrot.slane %v1317_v39, 4  ;;  %v1376_v35 = vadd.f32 %v1375_v56, %v1374_v1 }
 0x21e   :  { %v1262_v36 = vadd.f32 %v1261_v50, %v1260_v41  ;;  %v1319_v23 = vadd.f32 %v1318_v4, %v1317_v39  ;;  %v1377_v21 = vrot.slane %v1376_v35, 4 }
 0x220   :  { %v1263_v29 = vrot.slane %v1262_v36, 1  ;;  %v1320_v46 = vrot.slane %v1319_v23, 2  ;;  %v1378_v60 = vadd.f32 %v1377_v21, %v1376_v35 }
 0x222   :  { %v1264_v45 = vadd.f32 %v1263_v29, %v1262_v36  ;;  %v1321_v14 = vadd.f32 %v1320_v46, %v1319_v23  ;;  %v1379_v53 = vrot.slane %v1378_v60, 2 }
 0x224   :  { %v1265_v19 = vsel %vm1225_vm3, %v1264_v45, 0.0  ;;  %v1322_v42 = vrot.slane %v1321_v14, 1  ;;  %v1380_v38 = vadd.f32 %v1379_v53, %v1378_v60 }
 0x225   :  { %1266 = vadd.xlane.f32.xlu0 %v1265_v19 }
 0x226   :  { %v1323_v30 = vadd.f32 %v1322_v42, %v1321_v14  ;;  %v1381_v22 = vrot.slane %v1380_v38, 1 }
 0x228   :  { %v1324_v44 = vsel %vm1225_vm3, %v1323_v30, 0.0  ;;  %v1382_v15 = vadd.f32 %v1381_v22, %v1380_v38 }
 0x229   :  { %1325 = vadd.xlane.f32.xlu1 %v1324_v44 }
 0x22a   :  { %v1383_v40 = vsel %vm1225_vm3, %v1382_v15, 0.0 }
 0x22b   :  { %1384 = vadd.xlane.f32.xlu2 %v1383_v40 }
 0x298   :  { %v1267_v13 = vpop.xlane.xlu0 %1266 }
 0x299   :  { %v1268_v24 = vmul.f32 0.00048828125, %v1267_v13 }
 0x29b   :  { %1388 = vst.msk [vmem:[#allocation8] sm:$0x1] %vm1387_vm8, %v1268_v24 }
 0x29c   :  { %1403 = dma.vmem_to_hbm [thread:$0]  %s1399_s9, 16, %s1401_s12, [#allocation5]   ;;  %v1326_v3 = vpop.xlane.xlu1 %1325 }
 0x29d   :  { %v1327_v62 = vmul.f32 0.00048828125, %v1326_v3 }
 0x29e   :  { %v1385_v18 = vpop.xlane.xlu2 %1384 }
 0x29f   :  { %1389 = vst.msk [vmem:[#allocation11] sm:$0x1] %vm1387_vm8, %v1327_v62  ;;  %v1386_v11 = vmul.f32 0.00048828125, %v1385_v18 }
 0x2a1   :  { %v1391_v5 = vadd.f32 %v1386_v11, %v1327_v62  ;;  %1390 = vst.msk [vmem:[#allocation12] sm:$0x1] %vm1387_vm8, %v1386_v11 }
 0x2a2   :  { %1436 = dma.vmem_to_hbm [thread:$0]  %s1432_s14, 16, %s1434_s17, [#allocation13]  }
 0x2a3   :  { %1392 = vst.msk [vmem:[#allocation9] sm:$0x1] %vm1387_vm8, %v1391_v5 }
 0x2a4   :  { %1414 = dma.vmem_to_hbm [thread:$0]  %s1410_s19, 16, %s1412_s21, [#allocation10]  }
 0x2a5   :  { %1425 = dma.vmem_to_hbm [thread:$0]  %s1421_s23, 16, %s1423_s26, [#allocation10]  }
 0x2a6   :  { %1620 = dma.done.wait [#allocation5], 16  }
 0x2a7   :  { %1621 = vsyncadd [#allocation5], 4294967280 }
 0x2a8   :  { %1622 = dma.done.wait [#allocation10], 32  }
 0x2a9   :  { %1623 = vsyncadd [#allocation10], 4294967264 }
 0x2aa   :  { %1624 = dma.done.wait [#allocation13], 16  }
 0x2ab   :  { %1625 = vsyncadd [#allocation13], 4294967280 }
 0x2ac   :  { %1453 = vsyncpa [#allocation4], 1 }
 0x2ad   :  { %1454 = vsyncpa [#allocation7], 1 }
 0x2ae   :  { %1455 = vsyncpa [#allocation5], 1 }
 0x2af   :  { %1456 = vsyncpa [#allocation10], 1 }
 0x2b0   :  { %1457 = vsyncpa [#allocation13], 1 }

</bundles_post_ra>
